<compile_context>
chip_gen: v5e
topology: v5e:2x2
jax: 0.10.0
libtpu: 0.0.40
codegen_flags: <defaults>
</compile_context>

<pallas_src>
import functools

import jax
import jax.numpy as jnp
from jax.experimental import pallas as pl
from jax.experimental.pallas import tpu as pltpu


# ---------------------------------------------------------------------------
# Pallas kernel: one batch tile per grid step, fully fused
# ---------------------------------------------------------------------------
def _make_kernel(HW, Cout):
    def kernel(xcol_ref, cw_ref, cb_ref, fw_ref, fb_ref, out_ref):
        # xcol_ref: (bbp*HW, 9*Cin)  im2col slab for this batch tile
        # cw_ref  : (9*Cin, Cout)    fused conv weight
        # cb_ref  : (1, Cout)        conv bias
        # fw_ref  : (Cout, NCp)      classifier weight, zero-padded to 128 lanes
        # fb_ref  : (1, NCp)         classifier bias, zero-padded
        # out_ref : (bbp, NCp)       lane-dense logits slab
        x = xcol_ref[...]                                       # (bbp*HW, K)

        # Conv as a single fused K = 9*Cin matmul on the MXU, + bias + ReLU.
        y = jnp.dot(x, cw_ref[...], preferred_element_type=jnp.float32)
        y = jnp.maximum(y + cb_ref[...], 0.0)                   # (bbp*HW, Cout)

        # Global average pool: per-batch spatial reduction (no pool matrix).
        bbp = y.shape[0] // HW
        pooled = jnp.sum(y.reshape(bbp, HW, Cout), axis=1) * (1.0 / HW)

        # Classifier for the whole batch tile at once; lane-dense store.
        logits = jnp.dot(pooled, fw_ref[...],
                         preferred_element_type=jnp.float32) + fb_ref[...]
        out_ref[...] = logits.astype(out_ref.dtype)

    return kernel


# ---------------------------------------------------------------------------
# Parameters (deterministic synthetic model)
# ---------------------------------------------------------------------------
def init_params(cin=4, cout=8, num_classes=10):
    k = jax.random.PRNGKey(42)
    k1, k2, k3, k4 = jax.random.split(k, 4)
    conv_w = 0.1 * jax.random.normal(k1, (cout, cin, 3, 3), jnp.float32)  # OIHW
    conv_b = 0.1 * jax.random.normal(k2, (cout,), jnp.float32)
    fc_w = 0.1 * jax.random.normal(k3, (num_classes, cout), jnp.float32)  # [out, in]
    fc_b = 0.1 * jax.random.normal(k4, (num_classes,), jnp.float32)
    return conv_w, conv_b, fc_w, fc_b


# ---------------------------------------------------------------------------
# Wrapper: layout plumbing (im2col, padding) + pallas_call
# ---------------------------------------------------------------------------
@functools.partial(jax.jit, static_argnames=("batch_block",))
def model_wrapper_forward(x_nchw, params, batch_block=None):
    """Equivalent of ModelWrapper(model)(x): returns logits [B, num_classes]."""
    conv_w, conv_b, fc_w, fc_b = params
    B, Cin, H, W = x_nchw.shape
    Cout = conv_w.shape[0]
    NC = fc_w.shape[0]
    HW = H * W
    K = 9 * Cin

    # Pad the batch to a multiple of 8 so output blocks are unmasked (8,128)
    # stores; padded rows produce garbage logits that are sliced off below.
    Bp = ((B + 7) // 8) * 8
    bbp = Bp if batch_block is None else batch_block
    assert bbp % 8 == 0 and Bp % bbp == 0, \
        "batch_block must be a multiple of 8 that divides the padded batch"

    # ---- glue: NCHW -> NHWC, zero-pad, im2col (tap-major, then Cin) --------
    x = jnp.transpose(x_nchw, (0, 2, 3, 1)).astype(jnp.float32)   # (B,H,W,Cin)
    xp = jnp.pad(x, ((0, Bp - B), (1, 1), (1, 1), (0, 0)))        # batch+spatial pad
    taps = [xp[:, kh:kh + H, kw:kw + W, :]
            for kh in range(3) for kw in range(3)]
    x_col = jnp.concatenate(taps, axis=-1).reshape(Bp * HW, K)    # (Bp*HW, 36)

    # conv weight OIHW -> (kh, kw, Cin, Cout) -> (9*Cin, Cout); matches x_col.
    cw = jnp.transpose(conv_w, (2, 3, 1, 0)).reshape(K, Cout).astype(jnp.float32)
    cb = conv_b.reshape(1, Cout).astype(jnp.float32)

    # classifier, zero-padded to a lane-dense 128-wide output slab
    NCp = max(128, ((NC + 127) // 128) * 128)
    fw = jnp.zeros((Cout, NCp), jnp.float32).at[:, :NC].set(fc_w.T)
    fb = jnp.zeros((1, NCp), jnp.float32).at[:, :NC].set(fc_b)

    P = bbp * HW
    n_tiles = Bp // bbp
    flops = 2.0 * Bp * HW * K * Cout + 2.0 * Bp * Cout * NCp
    bytes_accessed = 4 * (Bp * HW * K + K * Cout + Cout
                          + Cout * NCp + NCp + Bp * NCp)

    out = pl.pallas_call(
        _make_kernel(HW, Cout),
        out_shape=jax.ShapeDtypeStruct((Bp, NCp), jnp.float32),
        grid=(n_tiles,),
        in_specs=[
            pl.BlockSpec((P, K), lambda b: (b, 0)),
            pl.BlockSpec((K, Cout), lambda b: (0, 0)),
            pl.BlockSpec((1, Cout), lambda b: (0, 0)),
            pl.BlockSpec((Cout, NCp), lambda b: (0, 0)),
            pl.BlockSpec((1, NCp), lambda b: (0, 0)),
        ],
        out_specs=pl.BlockSpec((bbp, NCp), lambda b: (b, 0)),
        compiler_params=pltpu.CompilerParams(
            dimension_semantics=("parallel",)),
        cost_estimate=pl.CostEstimate(
            flops=int(flops), transcendentals=0,
            bytes_accessed=int(bytes_accessed)),
    )(x_col, cw, cb, fw, fb)

    return out[:B, :NC]


# ---------------------------------------------------------------------------
# Pure-JAX reference for a sanity check
# ---------------------------------------------------------------------------
def reference_forward(x_nchw, params):
    conv_w, conv_b, fc_w, fc_b = params
    y = jax.lax.conv_general_dilated(
        x_nchw, conv_w, window_strides=(1, 1), padding="SAME",
        dimension_numbers=("NCHW", "OIHW", "NCHW"))
    y = y + conv_b[None, :, None, None]
    y = jnp.maximum(y, 0.0)
    pooled = jnp.mean(y, axis=(2, 3))                     # (B, Cout)
    return pooled @ fc_w.T + fc_b[None, :]                # (B, NC)


if __name__ == "__main__":
    B, Cin, H, W = 2, 4, 16, 16
    x = jax.random.normal(jax.random.PRNGKey(0), (B, Cin, H, W), jnp.float32)
    params = init_params(cin=Cin, cout=8, num_classes=10)

    logits = jax.block_until_ready(model_wrapper_forward(x, params))

    ref = reference_forward(x, params)
    assert logits.shape == (B, 10)
    err = float(jnp.max(jnp.abs(logits - ref)))
    assert jnp.allclose(logits, ref, atol=1e-4, rtol=1e-4), (
        f"mismatch: max abs err {err}")
    print("KERNEL_OK")
</pallas_src>

<mosaic_0001>
module attributes {stable_mosaic.version = 11 : i64} {
  func.func @kernel(%arg0: i32, %arg1: memref<2048x36xf32, #tpu.memory_space<vmem>>, %arg2: memref<36x8xf32, #tpu.memory_space<vmem>>, %arg3: memref<1x8xf32, #tpu.memory_space<vmem>>, %arg4: memref<8x128xf32, #tpu.memory_space<vmem>>, %arg5: memref<1x128xf32, #tpu.memory_space<vmem>>, %arg6: memref<8x128xf32, #tpu.memory_space<vmem>>) attributes {dimension_semantics = [#tpu.dimension_semantics<parallel>], iteration_bounds = array<i64: 1>, scalar_prefetch = 0 : i64, scratch_operands = 0 : i64, tpu.core_type = #tpu.core_type<tc>, window_params = [{transform_indices = @transform_0, window_bounds = array<i64: 2048, 36>}, {pipeline_mode = #tpu.pipeline_mode<synchronous>, transform_indices = @transform_1, window_bounds = array<i64: 36, 8>}, {pipeline_mode = #tpu.pipeline_mode<synchronous>, transform_indices = @transform_2, window_bounds = array<i64: 1, 8>}, {pipeline_mode = #tpu.pipeline_mode<synchronous>, transform_indices = @transform_3, window_bounds = array<i64: 8, 128>}, {pipeline_mode = #tpu.pipeline_mode<synchronous>, transform_indices = @transform_4, window_bounds = array<i64: 1, 128>}, {transform_indices = @transform_5, window_bounds = array<i64: 8, 128>}]} {
    %c0 = arith.constant 0 : index
    %c0_0 = arith.constant 0 : index
    %0 = vector.load %arg1[%c0, %c0_0] : memref<2048x36xf32, #tpu.memory_space<vmem>>, vector<2048x36xf32>
    %c0_1 = arith.constant 0 : index
    %c0_2 = arith.constant 0 : index
    %1 = vector.load %arg2[%c0_1, %c0_2] : memref<36x8xf32, #tpu.memory_space<vmem>>, vector<36x8xf32>
    %cst = arith.constant dense<0.000000e+00> : vector<2048x8xf32>
    %2 = tpu.matmul %0, %1, %cst {dimension_numbers = #tpu.dot_dimension_numbers<[1], [0], [0], [1], [0, 0, 1, 1], [], []>} : vector<2048x36xf32>, vector<36x8xf32>, vector<2048x8xf32> -> vector<2048x8xf32>
    %c0_3 = arith.constant 0 : index
    %c0_4 = arith.constant 0 : index
    %3 = vector.load %arg3[%c0_3, %c0_4] : memref<1x8xf32, #tpu.memory_space<vmem>>, vector<1x8xf32>
    %4 = vector.broadcast %3 : vector<1x8xf32> to vector<2048x8xf32>
    %5 = arith.addf %2, %4 : vector<2048x8xf32>
    %cst_5 = arith.constant 0.000000e+00 : f32
    %6 = vector.broadcast %cst_5 : f32 to vector<2048x8xf32>
    %7 = arith.maximumf %5, %6 : vector<2048x8xf32>
    %8 = vector.shape_cast %7 : vector<2048x8xf32> to vector<8x256x8xf32>
    %cst_6 = arith.constant dense<0.000000e+00> : vector<8x8xf32>
    %9 = vector.multi_reduction <add>, %8, %cst_6 [1] : vector<8x256x8xf32> to vector<8x8xf32>
    %cst_7 = arith.constant 3.906250e-03 : f32
    %10 = vector.broadcast %cst_7 : f32 to vector<8x8xf32>
    %11 = arith.mulf %9, %10 : vector<8x8xf32>
    %c0_8 = arith.constant 0 : index
    %c0_9 = arith.constant 0 : index
    %12 = vector.load %arg4[%c0_8, %c0_9] : memref<8x128xf32, #tpu.memory_space<vmem>>, vector<8x128xf32>
    %cst_10 = arith.constant dense<0.000000e+00> : vector<8x128xf32>
    %13 = tpu.matmul %11, %12, %cst_10 {dimension_numbers = #tpu.dot_dimension_numbers<[1], [0], [0], [1], [0, 0, 1, 1], [], []>} : vector<8x8xf32>, vector<8x128xf32>, vector<8x128xf32> -> vector<8x128xf32>
    %c0_11 = arith.constant 0 : index
    %c0_12 = arith.constant 0 : index
    %14 = vector.load %arg5[%c0_11, %c0_12] : memref<1x128xf32, #tpu.memory_space<vmem>>, vector<1x128xf32>
    %15 = vector.broadcast %14 : vector<1x128xf32> to vector<8x128xf32>
    %16 = arith.addf %13, %15 : vector<8x128xf32>
    %c0_13 = arith.constant 0 : index
    %c0_14 = arith.constant 0 : index
    %17 = vector.load %arg6[%c0_13, %c0_14] : memref<8x128xf32, #tpu.memory_space<vmem>>, vector<8x128xf32>
    tpu.vector_store %arg6[%c0_13, %c0_14], %16 {strides = array<i32>} : memref<8x128xf32, #tpu.memory_space<vmem>>, vector<8x128xf32>,
    return
  }
  func.func @transform_0(%arg0: i32) -> (i32, i32) {
    %c0_i32 = arith.constant 0 : i32
    %c0_i32_0 = arith.constant 0 : i32
    return %arg0, %c0_i32 : i32, i32
  }
  func.func @transform_1(%arg0: i32) -> (i32, i32) {
    %c0_i32 = arith.constant 0 : i32
    %c0_i32_0 = arith.constant 0 : i32
    %c0_i32_1 = arith.constant 0 : i32
    return %c0_i32, %c0_i32_0 : i32, i32
  }
  func.func @transform_2(%arg0: i32) -> (i32, i32) {
    %c0_i32 = arith.constant 0 : i32
    %c0_i32_0 = arith.constant 0 : i32
    %c0_i32_1 = arith.constant 0 : i32
    return %c0_i32, %c0_i32_0 : i32, i32
  }
  func.func @transform_3(%arg0: i32) -> (i32, i32) {
    %c0_i32 = arith.constant 0 : i32
    %c0_i32_0 = arith.constant 0 : i32
    %c0_i32_1 = arith.constant 0 : i32
    return %c0_i32, %c0_i32_0 : i32, i32
  }
  func.func @transform_4(%arg0: i32) -> (i32, i32) {
    %c0_i32 = arith.constant 0 : i32
    %c0_i32_0 = arith.constant 0 : i32
    %c0_i32_1 = arith.constant 0 : i32
    return %c0_i32, %c0_i32_0 : i32, i32
  }
  func.func @transform_5(%arg0: i32) -> (i32, i32) {
    %c0_i32 = arith.constant 0 : i32
    %c0_i32_0 = arith.constant 0 : i32
    return %arg0, %c0_i32 : i32, i32
  }
}

</mosaic_0001>

<bundles_post_ra>
// kernel: model_wrapper_forward.1
= control target key start
LH: loop header
LB: loop body
LE: loop exit
PB: predicated region body
PF: predicated region fallthrough
CT: control target
= control target key end

     0   :  { %vm1054_vm0 = vcmask 1043456   ;;  %vm285_vm1 = vcmask 293888   ;;  %vm2099_vm2 = vcmask 64512   ;;  %vm2673_vm3 = vcmask 1041409   ;;  %s4968_s1 = inlined_call_operand.vmem [shape: f32[36,8], index: 1, kind: input, shape index: {}]   ;;  %s4969_s0 = inlined_call_operand.vmem [shape: f32[2048,36], index: 0, kind: input, shape index: {}]   ;;  %s4970_s2 = inlined_call_operand.vmem [shape: f32[1,8], index: 2, kind: input, shape index: {}]   ;;  %s4971_s3 = inlined_call_operand.vmem [shape: f32[8,128], index: 3, kind: input, shape index: {}]   ;;  %s4972_s4 = inlined_call_operand.vmem [shape: f32[1,128], index: 4, kind: input, shape index: {}]   ;;  %s4973_s5 = inlined_call_operand.vmem [shape: f32[8,128], index: 5, kind: output, shape index: {}]  }
   0x1   :  { %v280_v0 = vld [vmem:[%s4968_s1 + $0x20] sm:$0xf]  ;;  %v279_v1 = vld [vmem:[%s4968_s1 + $0x18] sm:$0xff]  ;;  %v278_v2 = vld [vmem:[%s4968_s1 + $0x10] sm:$0xff]  ;;  %vm2675_vm4 = vcmask 1042434   ;;  %vm2677_vm5 = vcmask 1043459  }
   0x2   :  { %2714 = vmatpush.msk.msra.mxu0 %vm1054_vm0, %v280_v0  ;;  %2972 = vmatpush.msk.msra.mxu1 %vm1054_vm0, %v280_v0  ;;  %v277_v3 = vld [vmem:[%s4968_s1 + $0x8] sm:$0xff]  ;;  %v276_v4 = vld [vmem:[%s4968_s1] sm:$0xff]  ;;  %v147_v7 = vld [vmem:[%s4969_s0 + $0x3f8] sm:$0xff]  ;;  %vm2679_vm6 = vcmask 1044484   ;;  %vm2681_vm7 = vcmask 1045509   ;;  %vm2683_vm8 = vcmask 1046534  }
   0x3   :  { %2973 = vmatpush.msk.msra.mxu2 %vm1054_vm0, %v280_v0  ;;  %2974 = vmatpush.msk.msra.mxu3 %vm1054_vm0, %v280_v0  ;;  %v20_v5 = vld [vmem:[%s4969_s0] sm:$0xff]  ;;  %v211_v8 = vld [vmem:[%s4969_s0 + $0x5f8] sm:$0xff]  ;;  %v21_v9 = vld [vmem:[%s4969_s0 + $0x8] sm:$0xff]  ;;  %vm2685_vm9 = vcmask 1047559  }
   0x4   :  { %1070 = vmatpush.msra.mxu0 %v279_v1  ;;  %2975 = vmatpush.msra.mxu1 %v279_v1  ;;  %v84_v6 = vld [vmem:[%s4969_s0 + $0x200] sm:$0xff]  ;;  %v85_v10 = vld [vmem:[%s4969_s0 + $0x208] sm:$0xff]  ;;  %v22_v13 = vld [vmem:[%s4969_s0 + $0x10] sm:$0xff] }
   0x5   :  { %2976 = vmatpush.msra.mxu2 %v279_v1  ;;  %2977 = vmatpush.msra.mxu3 %v279_v1  ;;  %v148_v11 = vld [vmem:[%s4969_s0 + $0x400] sm:$0xff]  ;;  %v86_v14 = vld [vmem:[%s4969_s0 + $0x210] sm:$0xff]  ;;  %v149_v15 = vld [vmem:[%s4969_s0 + $0x408] sm:$0xff] }
   0x6   :  { %1071 = vmatpush.msra.mxu0 %v278_v2  ;;  %2978 = vmatpush.msra.mxu1 %v278_v2  ;;  %v212_v12 = vld [vmem:[%s4969_s0 + $0x600] sm:$0xff]  ;;  %v213_v16 = vld [vmem:[%s4969_s0 + $0x608] sm:$0xff]  ;;  %v23_v17 = vld [vmem:[%s4969_s0 + $0x18] sm:$0xff] }
   0x7   :  { %2979 = vmatpush.msra.mxu2 %v278_v2  ;;  %2980 = vmatpush.msra.mxu3 %v278_v2  ;;  %v87_v18 = vld [vmem:[%s4969_s0 + $0x218] sm:$0xff]  ;;  %v150_v19 = vld [vmem:[%s4969_s0 + $0x410] sm:$0xff]  ;;  %v24_v21 = vld [vmem:[%s4969_s0 + $0x20] sm:$0xff] }
   0x8   :  { %1072 = vmatpush.msra.mxu0 %v277_v3  ;;  %2981 = vmatpush.msra.mxu1 %v277_v3  ;;  %v214_v20 = vld [vmem:[%s4969_s0 + $0x610] sm:$0xff]  ;;  %v88_v22 = vld [vmem:[%s4969_s0 + $0x220] sm:$0xff]  ;;  %v151_v23 = vld [vmem:[%s4969_s0 + $0x418] sm:$0xff] }
   0x9   :  { %2982 = vmatpush.msra.mxu2 %v277_v3  ;;  %2983 = vmatpush.msra.mxu3 %v277_v3  ;;  %v215_v24 = vld [vmem:[%s4969_s0 + $0x618] sm:$0xff]  ;;  %v25_v25 = vld [vmem:[%s4969_s0 + $0x28] sm:$0xff]  ;;  %v152_v27 = vld [vmem:[%s4969_s0 + $0x420] sm:$0xff] }
   0xa   :  { %1073 = vmatpush.msra.mxu0 %v276_v4  ;;  %2984 = vmatpush.msra.mxu1 %v276_v4  ;;  %v89_v26 = vld [vmem:[%s4969_s0 + $0x228] sm:$0xff]  ;;  %v216_v28 = vld [vmem:[%s4969_s0 + $0x620] sm:$0xff]  ;;  %v26_v29 = vld [vmem:[%s4969_s0 + $0x30] sm:$0xff] }
   0xb   :  { %2985 = vmatpush.msra.mxu2 %v276_v4  ;;  %2986 = vmatpush.msra.mxu3 %v276_v4  ;;  %v90_v30 = vld [vmem:[%s4969_s0 + $0x230] sm:$0xff]  ;;  %v153_v31 = vld [vmem:[%s4969_s0 + $0x428] sm:$0xff]  ;;  %v27_v33 = vld [vmem:[%s4969_s0 + $0x38] sm:$0xff] }
   0xc   :  { %2715 = vmatmul.msk.f32.vlgmr.msra.gmra.mxu0 %vm285_vm1, %v20_v5  ;;  %2779 = vmatmul.msk.f32.vlgmr.msra.gmra.mxu1 %vm285_vm1, %v84_v6  ;;  %v217_v32 = vld [vmem:[%s4969_s0 + $0x628] sm:$0xff]  ;;  %v91_v34 = vld [vmem:[%s4969_s0 + $0x238] sm:$0xff]  ;;  %v154_v35 = vld [vmem:[%s4969_s0 + $0x430] sm:$0xff] }
   0xd   :  { %2842 = vmatmul.msk.f32.vlgmr.msra.gmra.mxu2 %vm285_vm1, %v147_v7  ;;  %2906 = vmatmul.msk.f32.vlgmr.msra.gmra.mxu3 %vm285_vm1, %v211_v8  ;;  %v218_v36 = vld [vmem:[%s4969_s0 + $0x630] sm:$0xff]  ;;  %v28_v37 = vld [vmem:[%s4969_s0 + $0x40] sm:$0xff]  ;;  %v155_v39 = vld [vmem:[%s4969_s0 + $0x438] sm:$0xff] }
   0xe   :  { %v92_v38 = vld [vmem:[%s4969_s0 + $0x240] sm:$0xff]  ;;  %v219_v40 = vld [vmem:[%s4969_s0 + $0x638] sm:$0xff]  ;;  %v29_v41 = vld [vmem:[%s4969_s0 + $0x48] sm:$0xff] }
   0xf   :  { %v93_v42 = vld [vmem:[%s4969_s0 + $0x248] sm:$0xff]  ;;  %v156_v43 = vld [vmem:[%s4969_s0 + $0x440] sm:$0xff]  ;;  %v30_v45 = vld [vmem:[%s4969_s0 + $0x50] sm:$0xff] }
  0x10   :  { %v220_v44 = vld [vmem:[%s4969_s0 + $0x640] sm:$0xff]  ;;  %v94_v46 = vld [vmem:[%s4969_s0 + $0x250] sm:$0xff]  ;;  %v157_v47 = vld [vmem:[%s4969_s0 + $0x448] sm:$0xff] }
  0x11   :  { %v221_v48 = vld [vmem:[%s4969_s0 + $0x648] sm:$0xff]  ;;  %v31_v49 = vld [vmem:[%s4969_s0 + $0x58] sm:$0xff]  ;;  %v158_v51 = vld [vmem:[%s4969_s0 + $0x450] sm:$0xff] }
  0x12   :  { %v95_v50 = vld [vmem:[%s4969_s0 + $0x258] sm:$0xff]  ;;  %v222_v52 = vld [vmem:[%s4969_s0 + $0x650] sm:$0xff]  ;;  %v32_v53 = vld [vmem:[%s4969_s0 + $0x60] sm:$0xff] }
  0x13   :  { %v96_v54 = vld [vmem:[%s4969_s0 + $0x260] sm:$0xff]  ;;  %v159_v55 = vld [vmem:[%s4969_s0 + $0x458] sm:$0xff]  ;;  %v33_v57 = vld [vmem:[%s4969_s0 + $0x68] sm:$0xff] }
  0x14   :  { %2716 = vmatmul.msk.f32.gmra.mxu0 %vm285_vm1, %v21_v9  ;;  %2780 = vmatmul.msk.f32.gmra.mxu1 %vm285_vm1, %v85_v10  ;;  %v223_v56 = vld [vmem:[%s4969_s0 + $0x658] sm:$0xff]  ;;  %v97_v58 = vld [vmem:[%s4969_s0 + $0x268] sm:$0xff]  ;;  %v160_v59 = vld [vmem:[%s4969_s0 + $0x460] sm:$0xff] }
  0x15   :  { %2843 = vmatmul.msk.f32.gmra.mxu2 %vm285_vm1, %v148_v11  ;;  %2907 = vmatmul.msk.f32.gmra.mxu3 %vm285_vm1, %v212_v12  ;;  %v224_v60 = vld [vmem:[%s4969_s0 + $0x660] sm:$0xff]  ;;  %v34_v61 = vld [vmem:[%s4969_s0 + $0x70] sm:$0xff]  ;;  %v161_v63 = vld [vmem:[%s4969_s0 + $0x468] sm:$0xff] }
  0x16   :  { %v98_v62 = vld [vmem:[%s4969_s0 + $0x270] sm:$0xff]  ;;  %v225_v0 = vld [vmem:[%s4969_s0 + $0x668] sm:$0xff]  ;;  %v35_v1 = vld [vmem:[%s4969_s0 + $0x78] sm:$0xff] }
  0x17   :  { %v99_v2 = vld [vmem:[%s4969_s0 + $0x278] sm:$0xff]  ;;  %v162_v3 = vld [vmem:[%s4969_s0 + $0x470] sm:$0xff]  ;;  %v36_v7 = vld [vmem:[%s4969_s0 + $0x80] sm:$0xff] }
  0x18   :  { %v226_v4 = vld [vmem:[%s4969_s0 + $0x670] sm:$0xff]  ;;  %v100_v8 = vld [vmem:[%s4969_s0 + $0x280] sm:$0xff]  ;;  %v163_v9 = vld [vmem:[%s4969_s0 + $0x478] sm:$0xff] }
  0x19   :  { %v227_v10 = vld [vmem:[%s4969_s0 + $0x678] sm:$0xff]  ;;  %v2660_v11 = vld [vmem:[%s4971_s3] sm:$0xff] }
  0x1a   :  { %2704 = vmatpush.msrb.mxu1 %v2660_v11  ;;  %v41_v11 = vld [vmem:[%s4969_s0 + $0xa8] sm:$0xff] }
  0x1c   :  { %2717 = vmatmul.msk.f32.gmra.mxu0 %vm285_vm1, %v22_v13  ;;  %2781 = vmatmul.msk.f32.gmra.mxu1 %vm285_vm1, %v86_v14 }
  0x1d   :  { %2844 = vmatmul.msk.f32.gmra.mxu2 %vm285_vm1, %v149_v15  ;;  %2908 = vmatmul.msk.f32.gmra.mxu3 %vm285_vm1, %v213_v16  ;;  %v37_v16 = vld [vmem:[%s4969_s0 + $0x88] sm:$0xff] }
  0x24   :  { %2718 = vmatmul.msk.f32.gmra.mxu0 %vm285_vm1, %v23_v17  ;;  %2782 = vmatmul.msk.f32.gmra.mxu1 %vm285_vm1, %v87_v18  ;;  %v101_v17 = vld [vmem:[%s4969_s0 + $0x288] sm:$0xff]  ;;  %v164_v18 = vld [vmem:[%s4969_s0 + $0x480] sm:$0xff] }
  0x25   :  { %2845 = vmatmul.msk.f32.gmra.mxu2 %vm285_vm1, %v150_v19  ;;  %2909 = vmatmul.msk.f32.gmra.mxu3 %vm285_vm1, %v214_v20  ;;  %v228_v19 = vld [vmem:[%s4969_s0 + $0x680] sm:$0xff] }
  0x2c   :  { %2719 = vmatmul.msk.f32.gmra.mxu0 %vm285_vm1, %v24_v21  ;;  %2783 = vmatmul.msk.f32.gmra.mxu1 %vm285_vm1, %v88_v22 }
  0x2d   :  { %2846 = vmatmul.msk.f32.gmra.mxu2 %vm285_vm1, %v151_v23  ;;  %2910 = vmatmul.msk.f32.gmra.mxu3 %vm285_vm1, %v215_v24  ;;  %v38_v24 = vld [vmem:[%s4969_s0 + $0x90] sm:$0xff] }
  0x34   :  { %2720 = vmatmul.msk.f32.gmra.mxu0 %vm285_vm1, %v25_v25  ;;  %2784 = vmatmul.msk.f32.gmra.mxu1 %vm285_vm1, %v89_v26  ;;  %v102_v25 = vld [vmem:[%s4969_s0 + $0x290] sm:$0xff]  ;;  %v165_v26 = vld [vmem:[%s4969_s0 + $0x488] sm:$0xff] }
  0x35   :  { %2847 = vmatmul.msk.f32.gmra.mxu2 %vm285_vm1, %v152_v27  ;;  %2911 = vmatmul.msk.f32.gmra.mxu3 %vm285_vm1, %v216_v28  ;;  %v229_v27 = vld [vmem:[%s4969_s0 + $0x688] sm:$0xff]  ;;  %v3359_v28 = vld [vmem:[%s4970_s2] ss:$0 sm:$0xff] }
  0x3c   :  { %2721 = vmatmul.msk.f32.gmra.mxu0 %vm285_vm1, %v26_v29  ;;  %2785 = vmatmul.msk.f32.gmra.mxu1 %vm285_vm1, %v90_v30 }
  0x3d   :  { %2848 = vmatmul.msk.f32.gmra.mxu2 %vm285_vm1, %v153_v31  ;;  %2912 = vmatmul.msk.f32.gmra.mxu3 %vm285_vm1, %v217_v32 }
  0x44   :  { %2722 = vmatmul.msk.f32.gmra.mxu0 %vm285_vm1, %v27_v33  ;;  %2786 = vmatmul.msk.f32.gmra.mxu1 %vm285_vm1, %v91_v34 }
  0x45   :  { %2849 = vmatmul.msk.f32.gmra.mxu2 %vm285_vm1, %v154_v35  ;;  %2913 = vmatmul.msk.f32.gmra.mxu3 %vm285_vm1, %v218_v36 }
  0x4c   :  { %2723 = vmatmul.msk.f32.gmra.mxu0 %vm285_vm1, %v28_v37  ;;  %2787 = vmatmul.msk.f32.gmra.mxu1 %vm285_vm1, %v92_v38 }
  0x4d   :  { %2850 = vmatmul.msk.f32.gmra.mxu2 %vm285_vm1, %v155_v39  ;;  %2914 = vmatmul.msk.f32.gmra.mxu3 %vm285_vm1, %v219_v40  ;;  %v39_v39 = vld [vmem:[%s4969_s0 + $0x98] sm:$0xff] }
  0x4e   :  { %v103_v40 = vld [vmem:[%s4969_s0 + $0x298] sm:$0xff] }
  0x54   :  { %2724 = vmatmul.msk.f32.gmra.mxu0 %vm285_vm1, %v29_v41  ;;  %2788 = vmatmul.msk.f32.gmra.mxu1 %vm285_vm1, %v93_v42  ;;  %v166_v41 = vld [vmem:[%s4969_s0 + $0x490] sm:$0xff] }
  0x55   :  { %2851 = vmatmul.msk.f32.gmra.mxu2 %vm285_vm1, %v156_v43  ;;  %2915 = vmatmul.msk.f32.gmra.mxu3 %vm285_vm1, %v220_v44  ;;  %v230_v42 = vld [vmem:[%s4969_s0 + $0x690] sm:$0xff] }
  0x5c   :  { %2725 = vmatmul.msk.f32.gmra.mxu0 %vm285_vm1, %v30_v45  ;;  %2789 = vmatmul.msk.f32.gmra.mxu1 %vm285_vm1, %v94_v46 }
  0x5d   :  { %2852 = vmatmul.msk.f32.gmra.mxu2 %vm285_vm1, %v157_v47  ;;  %2916 = vmatmul.msk.f32.gmra.mxu3 %vm285_vm1, %v221_v48 }
  0x64   :  { %2726 = vmatmul.msk.f32.gmra.mxu0 %vm285_vm1, %v31_v49  ;;  %2790 = vmatmul.msk.f32.gmra.mxu1 %vm285_vm1, %v95_v50 }
  0x65   :  { %2853 = vmatmul.msk.f32.gmra.mxu2 %vm285_vm1, %v158_v51  ;;  %2917 = vmatmul.msk.f32.gmra.mxu3 %vm285_vm1, %v222_v52 }
  0x6c   :  { %2727 = vmatmul.msk.f32.gmra.mxu0 %vm285_vm1, %v32_v53  ;;  %2791 = vmatmul.msk.f32.gmra.mxu1 %vm285_vm1, %v96_v54 }
  0x6d   :  { %2854 = vmatmul.msk.f32.gmra.mxu2 %vm285_vm1, %v159_v55  ;;  %2918 = vmatmul.msk.f32.gmra.mxu3 %vm285_vm1, %v223_v56 }
  0x74   :  { %2728 = vmatmul.msk.f32.gmra.mxu0 %vm285_vm1, %v33_v57  ;;  %2792 = vmatmul.msk.f32.gmra.mxu1 %vm285_vm1, %v97_v58  ;;  %v40_v57 = vld [vmem:[%s4969_s0 + $0xa0] sm:$0xff] }
  0x75   :  { %2855 = vmatmul.msk.f32.gmra.mxu2 %vm285_vm1, %v160_v59  ;;  %2919 = vmatmul.msk.f32.gmra.mxu3 %vm285_vm1, %v224_v60  ;;  %v104_v58 = vld [vmem:[%s4969_s0 + $0x2a0] sm:$0xff]  ;;  %v167_v59 = vld [vmem:[%s4969_s0 + $0x498] sm:$0xff] }
  0x76   :  { %v231_v60 = vld [vmem:[%s4969_s0 + $0x698] sm:$0xff] }
  0x7c   :  { %2729 = vmatmul.msk.f32.gmra.mxu0 %vm285_vm1, %v34_v61  ;;  %2793 = vmatmul.msk.f32.gmra.mxu1 %vm285_vm1, %v98_v62 }
  0x7d   :  { %2856 = vmatmul.msk.f32.gmra.mxu2 %vm285_vm1, %v161_v63  ;;  %2920 = vmatmul.msk.f32.gmra.mxu3 %vm285_vm1, %v225_v0 }
  0x84   :  { %2730 = vmatmul.msk.f32.gmra.mxu0 %vm285_vm1, %v35_v1  ;;  %2794 = vmatmul.msk.f32.gmra.mxu1 %vm285_vm1, %v99_v2 }
  0x85   :  { %2857 = vmatmul.msk.f32.gmra.mxu2 %vm285_vm1, %v162_v3  ;;  %2921 = vmatmul.msk.f32.gmra.mxu3 %vm285_vm1, %v226_v4 }
  0x89   :  { %v3293_v5 = vpop.f32.mrf.mxu0  ;;  %v3295_v6 = vpop.f32.mrf.mxu1 }
  0x8c   :  { %2731 = vmatmul.msk.f32.gmra.mxu0 %vm285_vm1, %v36_v7  ;;  %2795 = vmatmul.msk.f32.gmra.mxu1 %vm285_vm1, %v100_v8 }
  0x8d   :  { %2858 = vmatmul.msk.f32.gmra.mxu2 %vm285_vm1, %v163_v9  ;;  %2922 = vmatmul.msk.f32.gmra.mxu3 %vm285_vm1, %v227_v10 }
  0x90   :  { %v3316_v12 = vpop.f32.mrf.mxu2  ;;  %v3318_v13 = vpop.f32.mrf.mxu3 }
  0x91   :  { %4976 = vst [vmem:[#allocation2_spill] sm:$0xff] %v3316_v12  ;;  %v3320_v14 = vpop.f32.mrf.mxu0  ;;  %v3322_v15 = vpop.f32.mrf.mxu1 }
  0x92   :  { %4977 = vst [vmem:[#allocation3_spill] sm:$0xff] %v3318_v13 }
  0x94   :  { %2732 = vmatmul.msk.f32.gmra.mxu0 %vm285_vm1, %v37_v16  ;;  %2796 = vmatmul.msk.f32.gmra.mxu1 %vm285_vm1, %v101_v17  ;;  %v105_v16 = vld [vmem:[%s4969_s0 + $0x2a8] sm:$0xff]  ;;  %v168_v17 = vld [vmem:[%s4969_s0 + $0x4a0] sm:$0xff] }
  0x95   :  { %2859 = vmatmul.msk.f32.gmra.mxu2 %vm285_vm1, %v164_v18  ;;  %2923 = vmatmul.msk.f32.gmra.mxu3 %vm285_vm1, %v228_v19  ;;  %v232_v18 = vld [vmem:[%s4969_s0 + $0x6a0] sm:$0xff] }
  0x98   :  { %v1459_v20 = vpop.f32.mrf.mxu2  ;;  %v1651_v21 = vpop.f32.mrf.mxu3 }
  0x99   :  { %v3340_v22 = vpop.f32.mrf.mxu0  ;;  %v3342_v23 = vpop.f32.mrf.mxu1  ;;  %v1460_v29 = vadd.f32 %v3359_v28, %v1459_v20  ;;  %v1652_v30 = vadd.f32 %v3359_v28, %v1651_v21 }
  0x9b   :  { %v1971_v33 = vmax.f32 %v1460_v29, 0.0  ;;  %v2035_v34 = vmax.f32 %v1652_v30, 0.0 }
  0x9c   :  { %2733 = vmatmul.msk.f32.gmra.mxu0 %vm285_vm1, %v38_v24  ;;  %2797 = vmatmul.msk.f32.gmra.mxu1 %vm285_vm1, %v102_v25 }
  0x9d   :  { %2860 = vmatmul.msk.f32.gmra.mxu2 %vm285_vm1, %v165_v26  ;;  %2924 = vmatmul.msk.f32.gmra.mxu3 %vm285_vm1, %v229_v27  ;;  %v2376_v45 = vsel %vm2099_vm2, %v1971_v33, 0.0  ;;  %v2514_v46 = vsel %vm2099_vm2, %v2035_v34, 0.0  ;;  %v42_v34 = vld [vmem:[%s4969_s0 + $0xb0] sm:$0xff] }
  0xa0   :  { %v1462_v31 = vpop.f32.mrf.mxu2  ;;  %v1654_v32 = vpop.f32.mrf.mxu3 }
  0xa1   :  { %v1463_v35 = vadd.f32 %v3359_v28, %v1462_v31  ;;  %v1655_v36 = vadd.f32 %v3359_v28, %v1654_v32  ;;  %v3369_v37 = vpop.f32.mrf.mxu0  ;;  %v3371_v38 = vpop.f32.mrf.mxu1 }
  0xa3   :  { %v1972_v43 = vmax.f32 %v1463_v35, 0.0  ;;  %v2036_v44 = vmax.f32 %v1655_v36, 0.0  ;;  %v106_v35 = vld [vmem:[%s4969_s0 + $0x2b0] sm:$0xff]  ;;  %v169_v36 = vld [vmem:[%s4969_s0 + $0x4a8] sm:$0xff] }
  0xa4   :  { %2734 = vmatmul.msk.f32.gmra.mxu0 %vm285_vm1, %v39_v39  ;;  %2798 = vmatmul.msk.f32.gmra.mxu1 %vm285_vm1, %v103_v40  ;;  %v233_v39 = vld [vmem:[%s4969_s0 + $0x6a8] sm:$0xff] }
  0xa5   :  { %v2377_v47 = vsel %vm2099_vm2, %v1972_v43, 0.0  ;;  %v2515_v48 = vsel %vm2099_vm2, %v2036_v44, 0.0  ;;  %2861 = vmatmul.msk.f32.gmra.mxu2 %vm285_vm1, %v166_v41  ;;  %2925 = vmatmul.msk.f32.gmra.mxu3 %vm285_vm1, %v230_v42 }
  0xa6   :  { %v2378_v49 = vadd.f32 %v2377_v47, %v2376_v45  ;;  %v2516_v50 = vadd.f32 %v2515_v48, %v2514_v46 }
  0xa8   :  { %v1465_v51 = vpop.f32.mrf.mxu2  ;;  %v1657_v52 = vpop.f32.mrf.mxu3 }
  0xa9   :  { %v1466_v53 = vadd.f32 %v3359_v28, %v1465_v51  ;;  %v1658_v54 = vadd.f32 %v3359_v28, %v1657_v52  ;;  %v3395_v55 = vpop.f32.mrf.mxu0  ;;  %v3397_v56 = vpop.f32.mrf.mxu1  ;;  %v43_v52 = vld [vmem:[%s4969_s0 + $0xb8] sm:$0xff] }
  0xab   :  { %v1973_v61 = vmax.f32 %v1466_v53, 0.0  ;;  %v2037_v62 = vmax.f32 %v1658_v54, 0.0  ;;  %v107_v53 = vld [vmem:[%s4969_s0 + $0x2b8] sm:$0xff]  ;;  %v170_v54 = vld [vmem:[%s4969_s0 + $0x4b0] sm:$0xff] }
  0xac   :  { %2735 = vmatmul.msk.f32.gmra.mxu0 %vm285_vm1, %v40_v57  ;;  %2799 = vmatmul.msk.f32.gmra.mxu1 %vm285_vm1, %v104_v58  ;;  %v234_v57 = vld [vmem:[%s4969_s0 + $0x6b0] sm:$0xff] }
  0xad   :  { %v2379_v63 = vsel %vm2099_vm2, %v1973_v61, 0.0  ;;  %v2517_v0 = vsel %vm2099_vm2, %v2037_v62, 0.0  ;;  %2862 = vmatmul.msk.f32.gmra.mxu2 %vm285_vm1, %v167_v59  ;;  %2926 = vmatmul.msk.f32.gmra.mxu3 %vm285_vm1, %v231_v60 }
  0xae   :  { %v2380_v1 = vadd.f32 %v2379_v63, %v2378_v49  ;;  %v2518_v2 = vadd.f32 %v2517_v0, %v2516_v50 }
  0xb0   :  { %v1468_v3 = vpop.f32.mrf.mxu2  ;;  %v1660_v4 = vpop.f32.mrf.mxu3 }
  0xb1   :  { %v1469_v7 = vadd.f32 %v3359_v28, %v1468_v3  ;;  %v1661_v8 = vadd.f32 %v3359_v28, %v1660_v4  ;;  %v3419_v9 = vpop.f32.mrf.mxu0  ;;  %v3421_v10 = vpop.f32.mrf.mxu1 }
  0xb3   :  { %v1974_v19 = vmax.f32 %v1469_v7, 0.0  ;;  %v2038_v20 = vmax.f32 %v1661_v8, 0.0  ;;  %v44_v8 = vld [vmem:[%s4969_s0 + $0xc0] sm:$0xff] }
  0xb4   :  { %2736 = vmatmul.msk.f32.gmra.mxu0 %vm285_vm1, %v41_v11  ;;  %2800 = vmatmul.msk.f32.gmra.mxu1 %vm285_vm1, %v105_v16  ;;  %v108_v11 = vld [vmem:[%s4969_s0 + $0x2c0] sm:$0xff]  ;;  %v171_v16 = vld [vmem:[%s4969_s0 + $0x4b8] sm:$0xff] }
  0xb5   :  { %v2381_v21 = vsel %vm2099_vm2, %v1974_v19, 0.0  ;;  %v2519_v24 = vsel %vm2099_vm2, %v2038_v20, 0.0  ;;  %2863 = vmatmul.msk.f32.gmra.mxu2 %vm285_vm1, %v168_v17  ;;  %2927 = vmatmul.msk.f32.gmra.mxu3 %vm285_vm1, %v232_v18  ;;  %v235_v17 = vld [vmem:[%s4969_s0 + $0x6b8] sm:$0xff] }
  0xb6   :  { %v2382_v25 = vadd.f32 %v2381_v21, %v2380_v1  ;;  %v2520_v26 = vadd.f32 %v2519_v24, %v2518_v2 }
  0xb8   :  { %v1471_v27 = vpop.f32.mrf.mxu2  ;;  %v1663_v29 = vpop.f32.mrf.mxu3 }
  0xb9   :  { %v1472_v30 = vadd.f32 %v3359_v28, %v1471_v27  ;;  %v1664_v31 = vadd.f32 %v3359_v28, %v1663_v29  ;;  %v3443_v32 = vpop.f32.mrf.mxu0  ;;  %v3445_v33 = vpop.f32.mrf.mxu1 }
  0xbb   :  { %v1975_v40 = vmax.f32 %v1472_v30, 0.0  ;;  %v2039_v41 = vmax.f32 %v1664_v31, 0.0 }
  0xbc   :  { %2737 = vmatmul.msk.f32.gmra.mxu0 %vm285_vm1, %v42_v34  ;;  %2801 = vmatmul.msk.f32.gmra.mxu1 %vm285_vm1, %v106_v35  ;;  %v45_v35 = vld [vmem:[%s4969_s0 + $0xc8] sm:$0xff] }
  0xbd   :  { %v2383_v42 = vsel %vm2099_vm2, %v1975_v40, 0.0  ;;  %v2521_v43 = vsel %vm2099_vm2, %v2039_v41, 0.0  ;;  %2864 = vmatmul.msk.f32.gmra.mxu2 %vm285_vm1, %v169_v36  ;;  %2928 = vmatmul.msk.f32.gmra.mxu3 %vm285_vm1, %v233_v39  ;;  %v109_v36 = vld [vmem:[%s4969_s0 + $0x2c8] sm:$0xff]  ;;  %v172_v39 = vld [vmem:[%s4969_s0 + $0x4c0] sm:$0xff] }
  0xbe   :  { %v2384_v44 = vadd.f32 %v2383_v42, %v2382_v25  ;;  %v2522_v45 = vadd.f32 %v2521_v43, %v2520_v26  ;;  %v236_v40 = vld [vmem:[%s4969_s0 + $0x6c0] sm:$0xff] }
  0xc0   :  { %v1474_v46 = vpop.f32.mrf.mxu2  ;;  %v1666_v47 = vpop.f32.mrf.mxu3 }
  0xc1   :  { %v1475_v48 = vadd.f32 %v3359_v28, %v1474_v46  ;;  %v1667_v49 = vadd.f32 %v3359_v28, %v1666_v47  ;;  %v3467_v50 = vpop.f32.mrf.mxu0  ;;  %v3469_v51 = vpop.f32.mrf.mxu1 }
  0xc3   :  { %v1976_v58 = vmax.f32 %v1475_v48, 0.0  ;;  %v2040_v59 = vmax.f32 %v1667_v49, 0.0 }
  0xc4   :  { %2738 = vmatmul.msk.f32.gmra.mxu0 %vm285_vm1, %v43_v52  ;;  %2802 = vmatmul.msk.f32.gmra.mxu1 %vm285_vm1, %v107_v53 }
  0xc5   :  { %v2385_v60 = vsel %vm2099_vm2, %v1976_v58, 0.0  ;;  %v2523_v61 = vsel %vm2099_vm2, %v2040_v59, 0.0  ;;  %2865 = vmatmul.msk.f32.gmra.mxu2 %vm285_vm1, %v170_v54  ;;  %2929 = vmatmul.msk.f32.gmra.mxu3 %vm285_vm1, %v234_v57  ;;  %v46_v57 = vld [vmem:[%s4969_s0 + $0xd0] sm:$0xff]  ;;  %v173_v59 = vld [vmem:[%s4969_s0 + $0x4c8] sm:$0xff] }
  0xc6   :  { %v2386_v62 = vadd.f32 %v2385_v60, %v2384_v44  ;;  %v2524_v63 = vadd.f32 %v2523_v61, %v2522_v45  ;;  %v110_v58 = vld [vmem:[%s4969_s0 + $0x2d0] sm:$0xff]  ;;  %v237_v60 = vld [vmem:[%s4969_s0 + $0x6c8] sm:$0xff] }
  0xc8   :  { %v1477_v0 = vpop.f32.mrf.mxu2  ;;  %v1669_v1 = vpop.f32.mrf.mxu3 }
  0xc9   :  { %v1478_v2 = vadd.f32 %v3359_v28, %v1477_v0  ;;  %v1670_v3 = vadd.f32 %v3359_v28, %v1669_v1  ;;  %v3491_v4 = vpop.f32.mrf.mxu0  ;;  %v3493_v7 = vpop.f32.mrf.mxu1 }
  0xcb   :  { %v1977_v18 = vmax.f32 %v1478_v2, 0.0  ;;  %v2041_v19 = vmax.f32 %v1670_v3, 0.0 }
  0xcc   :  { %2739 = vmatmul.msk.f32.gmra.mxu0 %vm285_vm1, %v44_v8  ;;  %2803 = vmatmul.msk.f32.gmra.mxu1 %vm285_vm1, %v108_v11 }
  0xcd   :  { %v2387_v20 = vsel %vm2099_vm2, %v1977_v18, 0.0  ;;  %v2525_v21 = vsel %vm2099_vm2, %v2041_v19, 0.0  ;;  %2866 = vmatmul.msk.f32.gmra.mxu2 %vm285_vm1, %v171_v16  ;;  %2930 = vmatmul.msk.f32.gmra.mxu3 %vm285_vm1, %v235_v17  ;;  %v47_v19 = vld [vmem:[%s4969_s0 + $0xd8] sm:$0xff] }
  0xce   :  { %v2388_v24 = vadd.f32 %v2387_v20, %v2386_v62  ;;  %v2526_v25 = vadd.f32 %v2525_v21, %v2524_v63  ;;  %v111_v20 = vld [vmem:[%s4969_s0 + $0x2d8] sm:$0xff]  ;;  %v174_v21 = vld [vmem:[%s4969_s0 + $0x4d0] sm:$0xff] }
  0xd0   :  { %v1480_v26 = vpop.f32.mrf.mxu2  ;;  %v1672_v27 = vpop.f32.mrf.mxu3 }
  0xd1   :  { %v1481_v29 = vadd.f32 %v3359_v28, %v1480_v26  ;;  %v1673_v30 = vadd.f32 %v3359_v28, %v1672_v27  ;;  %v3515_v31 = vpop.f32.mrf.mxu0  ;;  %v3517_v34 = vpop.f32.mrf.mxu1 }
  0xd3   :  { %v1978_v41 = vmax.f32 %v1481_v29, 0.0  ;;  %v2042_v42 = vmax.f32 %v1673_v30, 0.0 }
  0xd4   :  { %2740 = vmatmul.msk.f32.gmra.mxu0 %vm285_vm1, %v45_v35  ;;  %2804 = vmatmul.msk.f32.gmra.mxu1 %vm285_vm1, %v109_v36 }
  0xd5   :  { %v2389_v43 = vsel %vm2099_vm2, %v1978_v41, 0.0  ;;  %v2527_v44 = vsel %vm2099_vm2, %v2042_v42, 0.0  ;;  %2867 = vmatmul.msk.f32.gmra.mxu2 %vm285_vm1, %v172_v39  ;;  %2931 = vmatmul.msk.f32.gmra.mxu3 %vm285_vm1, %v236_v40 }
  0xd6   :  { %v2390_v45 = vadd.f32 %v2389_v43, %v2388_v24  ;;  %v2528_v46 = vadd.f32 %v2527_v44, %v2526_v25  ;;  %v238_v24 = vld [vmem:[%s4969_s0 + $0x6d0] sm:$0xff]  ;;  %v48_v44 = vld [vmem:[%s4969_s0 + $0xe0] sm:$0xff] }
  0xd8   :  { %v1483_v47 = vpop.f32.mrf.mxu2  ;;  %v1675_v48 = vpop.f32.mrf.mxu3 }
  0xd9   :  { %v1484_v49 = vadd.f32 %v3359_v28, %v1483_v47  ;;  %v1676_v52 = vadd.f32 %v3359_v28, %v1675_v48  ;;  %v3539_v53 = vpop.f32.mrf.mxu0  ;;  %v3541_v54 = vpop.f32.mrf.mxu1  ;;  %v239_v47 = vld [vmem:[%s4969_s0 + $0x6d8] sm:$0xff] }
  0xdb   :  { %v1979_v61 = vmax.f32 %v1484_v49, 0.0  ;;  %v2043_v62 = vmax.f32 %v1676_v52, 0.0 }
  0xdc   :  { %2741 = vmatmul.msk.f32.gmra.mxu0 %vm285_vm1, %v46_v57  ;;  %2805 = vmatmul.msk.f32.gmra.mxu1 %vm285_vm1, %v110_v58 }
  0xdd   :  { %v2391_v63 = vsel %vm2099_vm2, %v1979_v61, 0.0  ;;  %v2529_v0 = vsel %vm2099_vm2, %v2043_v62, 0.0  ;;  %2868 = vmatmul.msk.f32.gmra.mxu2 %vm285_vm1, %v173_v59  ;;  %2932 = vmatmul.msk.f32.gmra.mxu3 %vm285_vm1, %v237_v60 }
  0xde   :  { %v2392_v1 = vadd.f32 %v2391_v63, %v2390_v45  ;;  %v2530_v2 = vadd.f32 %v2529_v0, %v2528_v46  ;;  %v112_v45 = vld [vmem:[%s4969_s0 + $0x2e0] sm:$0xff]  ;;  %v175_v46 = vld [vmem:[%s4969_s0 + $0x4d8] sm:$0xff] }
  0xe0   :  { %v1486_v3 = vpop.f32.mrf.mxu2  ;;  %v1678_v8 = vpop.f32.mrf.mxu3 }
  0xe1   :  { %v1487_v11 = vadd.f32 %v3359_v28, %v1486_v3  ;;  %v1679_v16 = vadd.f32 %v3359_v28, %v1678_v8  ;;  %v3563_v17 = vpop.f32.mrf.mxu0  ;;  %v3565_v18 = vpop.f32.mrf.mxu1  ;;  %v113_v3 = vld [vmem:[%s4969_s0 + $0x2e8] sm:$0xff]  ;;  %v176_v8 = vld [vmem:[%s4969_s0 + $0x4e0] sm:$0xff] }
  0xe3   :  { %v1980_v25 = vmax.f32 %v1487_v11, 0.0  ;;  %v2044_v26 = vmax.f32 %v1679_v16, 0.0  ;;  %v240_v11 = vld [vmem:[%s4969_s0 + $0x6e0] sm:$0xff] }
  0xe4   :  { %2742 = vmatmul.msk.f32.gmra.mxu0 %vm285_vm1, %v47_v19  ;;  %2806 = vmatmul.msk.f32.gmra.mxu1 %vm285_vm1, %v111_v20 }
  0xe5   :  { %v2393_v27 = vsel %vm2099_vm2, %v1980_v25, 0.0  ;;  %v2531_v29 = vsel %vm2099_vm2, %v2044_v26, 0.0  ;;  %2869 = vmatmul.msk.f32.gmra.mxu2 %vm285_vm1, %v174_v21  ;;  %2933 = vmatmul.msk.f32.gmra.mxu3 %vm285_vm1, %v238_v24 }
  0xe6   :  { %v2394_v30 = vadd.f32 %v2393_v27, %v2392_v1  ;;  %v2532_v35 = vadd.f32 %v2531_v29, %v2530_v2  ;;  %v49_v2 = vld [vmem:[%s4969_s0 + $0xe8] sm:$0xff] }
  0xe8   :  { %v1489_v36 = vpop.f32.mrf.mxu2  ;;  %v1681_v39 = vpop.f32.mrf.mxu3 }
  0xe9   :  { %v1490_v40 = vadd.f32 %v3359_v28, %v1489_v36  ;;  %v1682_v41 = vadd.f32 %v3359_v28, %v1681_v39  ;;  %v3587_v42 = vpop.f32.mrf.mxu0  ;;  %v3589_v43 = vpop.f32.mrf.mxu1  ;;  %v50_v39 = vld [vmem:[%s4969_s0 + $0xf0] sm:$0xff] }
  0xeb   :  { %v1981_v48 = vmax.f32 %v1490_v40, 0.0  ;;  %v2045_v49 = vmax.f32 %v1682_v41, 0.0  ;;  %v114_v40 = vld [vmem:[%s4969_s0 + $0x2f0] sm:$0xff]  ;;  %v177_v41 = vld [vmem:[%s4969_s0 + $0x4e8] sm:$0xff] }
  0xec   :  { %2743 = vmatmul.msk.f32.gmra.mxu0 %vm285_vm1, %v48_v44  ;;  %2807 = vmatmul.msk.f32.gmra.mxu1 %vm285_vm1, %v112_v45  ;;  %v241_v44 = vld [vmem:[%s4969_s0 + $0x6e8] sm:$0xff] }
  0xed   :  { %v2395_v52 = vsel %vm2099_vm2, %v1981_v48, 0.0  ;;  %v2533_v57 = vsel %vm2099_vm2, %v2045_v49, 0.0  ;;  %2870 = vmatmul.msk.f32.gmra.mxu2 %vm285_vm1, %v175_v46  ;;  %2934 = vmatmul.msk.f32.gmra.mxu3 %vm285_vm1, %v239_v47 }
  0xee   :  { %v2396_v58 = vadd.f32 %v2395_v52, %v2394_v30  ;;  %v2534_v59 = vadd.f32 %v2533_v57, %v2532_v35 }
  0xf0   :  { %v1492_v60 = vpop.f32.mrf.mxu2  ;;  %v1684_v61 = vpop.f32.mrf.mxu3 }
  0xf1   :  { %v1493_v62 = vadd.f32 %v3359_v28, %v1492_v60  ;;  %v1685_v63 = vadd.f32 %v3359_v28, %v1684_v61  ;;  %v3611_v0 = vpop.f32.mrf.mxu0  ;;  %v3613_v1 = vpop.f32.mrf.mxu1 }
  0xf3   :  { %v1982_v16 = vmax.f32 %v1493_v62, 0.0  ;;  %v2046_v19 = vmax.f32 %v1685_v63, 0.0  ;;  %v51_v63 = vld [vmem:[%s4969_s0 + $0xf8] sm:$0xff] }
  0xf4   :  { %2744 = vmatmul.msk.f32.gmra.mxu0 %vm285_vm1, %v49_v2  ;;  %2808 = vmatmul.msk.f32.gmra.mxu1 %vm285_vm1, %v113_v3  ;;  %v115_v2 = vld [vmem:[%s4969_s0 + $0x2f8] sm:$0xff]  ;;  %v178_v3 = vld [vmem:[%s4969_s0 + $0x4f0] sm:$0xff] }
  0xf5   :  { %v2397_v20 = vsel %vm2099_vm2, %v1982_v16, 0.0  ;;  %v2535_v21 = vsel %vm2099_vm2, %v2046_v19, 0.0  ;;  %2871 = vmatmul.msk.f32.gmra.mxu2 %vm285_vm1, %v176_v8  ;;  %2935 = vmatmul.msk.f32.gmra.mxu3 %vm285_vm1, %v240_v11  ;;  %v242_v8 = vld [vmem:[%s4969_s0 + $0x6f0] sm:$0xff] }
  0xf6   :  { %v2398_v24 = vadd.f32 %v2397_v20, %v2396_v58  ;;  %v2536_v25 = vadd.f32 %v2535_v21, %v2534_v59 }
  0xf8   :  { %v1495_v26 = vpop.f32.mrf.mxu2  ;;  %v1687_v27 = vpop.f32.mrf.mxu3 }
  0xf9   :  { %v1496_v29 = vadd.f32 %v3359_v28, %v1495_v26  ;;  %v1688_v30 = vadd.f32 %v3359_v28, %v1687_v27  ;;  %v3635_v35 = vpop.f32.mrf.mxu0  ;;  %v3637_v36 = vpop.f32.mrf.mxu1 }
  0xfb   :  { %v1983_v45 = vmax.f32 %v1496_v29, 0.0  ;;  %v2047_v46 = vmax.f32 %v1688_v30, 0.0 }
  0xfc   :  { %2745 = vmatmul.msk.f32.gmra.mxu0 %vm285_vm1, %v50_v39  ;;  %2809 = vmatmul.msk.f32.gmra.mxu1 %vm285_vm1, %v114_v40  ;;  %v52_v40 = vld [vmem:[%s4969_s0 + $0x100] sm:$0xff] }
  0xfd   :  { %v2399_v47 = vsel %vm2099_vm2, %v1983_v45, 0.0  ;;  %v2537_v48 = vsel %vm2099_vm2, %v2047_v46, 0.0  ;;  %2872 = vmatmul.msk.f32.gmra.mxu2 %vm285_vm1, %v177_v41  ;;  %2936 = vmatmul.msk.f32.gmra.mxu3 %vm285_vm1, %v241_v44  ;;  %v116_v41 = vld [vmem:[%s4969_s0 + $0x300] sm:$0xff]  ;;  %v179_v44 = vld [vmem:[%s4969_s0 + $0x4f8] sm:$0xff] }
  0xfe   :  { %v2400_v49 = vadd.f32 %v2399_v47, %v2398_v24  ;;  %v2538_v52 = vadd.f32 %v2537_v48, %v2536_v25  ;;  %v243_v45 = vld [vmem:[%s4969_s0 + $0x6f8] sm:$0xff] }
 0x100   :  { %v1498_v57 = vpop.f32.mrf.mxu2  ;;  %v1690_v58 = vpop.f32.mrf.mxu3 }
 0x101   :  { %v1499_v59 = vadd.f32 %v3359_v28, %v1498_v57  ;;  %v1691_v60 = vadd.f32 %v3359_v28, %v1690_v58  ;;  %v3659_v61 = vpop.f32.mrf.mxu0  ;;  %v3661_v62 = vpop.f32.mrf.mxu1 }
 0x103   :  { %v1984_v11 = vmax.f32 %v1499_v59, 0.0  ;;  %v2048_v16 = vmax.f32 %v1691_v60, 0.0 }
 0x104   :  { %2746 = vmatmul.msk.f32.gmra.mxu0 %vm285_vm1, %v51_v63  ;;  %2810 = vmatmul.msk.f32.gmra.mxu1 %vm285_vm1, %v115_v2 }
 0x105   :  { %v2401_v19 = vsel %vm2099_vm2, %v1984_v11, 0.0  ;;  %v2539_v20 = vsel %vm2099_vm2, %v2048_v16, 0.0  ;;  %2873 = vmatmul.msk.f32.gmra.mxu2 %vm285_vm1, %v178_v3  ;;  %2937 = vmatmul.msk.f32.gmra.mxu3 %vm285_vm1, %v242_v8  ;;  %v53_v8 = vld [vmem:[%s4969_s0 + $0x108] sm:$0xff]  ;;  %v180_v16 = vld [vmem:[%s4969_s0 + $0x500] sm:$0xff] }
 0x106   :  { %v2402_v21 = vadd.f32 %v2401_v19, %v2400_v49  ;;  %v2540_v24 = vadd.f32 %v2539_v20, %v2538_v52  ;;  %v117_v11 = vld [vmem:[%s4969_s0 + $0x308] sm:$0xff]  ;;  %v244_v19 = vld [vmem:[%s4969_s0 + $0x700] sm:$0xff] }
 0x108   :  { %v1501_v25 = vpop.f32.mrf.mxu2  ;;  %v1693_v26 = vpop.f32.mrf.mxu3 }
 0x109   :  { %v1502_v27 = vadd.f32 %v3359_v28, %v1501_v25  ;;  %v1694_v29 = vadd.f32 %v3359_v28, %v1693_v26  ;;  %v3683_v30 = vpop.f32.mrf.mxu0  ;;  %v3685_v39 = vpop.f32.mrf.mxu1 }
 0x10a   :  { %4978 = vst [vmem:[#allocation4_spill] sm:$0xff] %v3683_v30 }
 0x10b   :  { %4979 = vst [vmem:[#allocation5_spill] sm:$0xff] %v3685_v39  ;;  %v1985_v46 = vmax.f32 %v1502_v27, 0.0  ;;  %v2049_v47 = vmax.f32 %v1694_v29, 0.0 }
 0x10c   :  { %2747 = vmatmul.msk.f32.gmra.mxu0 %vm285_vm1, %v52_v40  ;;  %2811 = vmatmul.msk.f32.gmra.mxu1 %vm285_vm1, %v116_v41 }
 0x10d   :  { %v2403_v48 = vsel %vm2099_vm2, %v1985_v46, 0.0  ;;  %v2541_v49 = vsel %vm2099_vm2, %v2049_v47, 0.0  ;;  %2874 = vmatmul.msk.f32.gmra.mxu2 %vm285_vm1, %v179_v44  ;;  %2938 = vmatmul.msk.f32.gmra.mxu3 %vm285_vm1, %v243_v45  ;;  %v54_v47 = vld [vmem:[%s4969_s0 + $0x110] sm:$0xff] }
 0x10e   :  { %v2404_v52 = vadd.f32 %v2403_v48, %v2402_v21  ;;  %v2542_v57 = vadd.f32 %v2541_v49, %v2540_v24  ;;  %v118_v48 = vld [vmem:[%s4969_s0 + $0x310] sm:$0xff]  ;;  %v181_v49 = vld [vmem:[%s4969_s0 + $0x508] sm:$0xff] }
 0x110   :  { %v1504_v58 = vpop.f32.mrf.mxu2  ;;  %v1696_v59 = vpop.f32.mrf.mxu3 }
 0x111   :  { %v1505_v60 = vadd.f32 %v3359_v28, %v1504_v58  ;;  %v1697_v63 = vadd.f32 %v3359_v28, %v1696_v59  ;;  %v3707_v2 = vpop.f32.mrf.mxu0  ;;  %v3709_v3 = vpop.f32.mrf.mxu1 }
 0x112   :  { %4980 = vst [vmem:[#allocation6_spill] sm:$0xff] %v3707_v2 }
 0x113   :  { %4981 = vst [vmem:[#allocation7_spill] sm:$0xff] %v3709_v3  ;;  %v1986_v20 = vmax.f32 %v1505_v60, 0.0  ;;  %v2050_v21 = vmax.f32 %v1697_v63, 0.0 }
 0x114   :  { %2748 = vmatmul.msk.f32.gmra.mxu0 %vm285_vm1, %v53_v8  ;;  %2812 = vmatmul.msk.f32.gmra.mxu1 %vm285_vm1, %v117_v11 }
 0x115   :  { %v2405_v24 = vsel %vm2099_vm2, %v1986_v20, 0.0  ;;  %v2543_v25 = vsel %vm2099_vm2, %v2050_v21, 0.0  ;;  %2875 = vmatmul.msk.f32.gmra.mxu2 %vm285_vm1, %v180_v16  ;;  %2939 = vmatmul.msk.f32.gmra.mxu3 %vm285_vm1, %v244_v19 }
 0x116   :  { %v2406_v26 = vadd.f32 %v2405_v24, %v2404_v52  ;;  %v2544_v27 = vadd.f32 %v2543_v25, %v2542_v57  ;;  %v245_v52 = vld [vmem:[%s4969_s0 + $0x708] sm:$0xff]  ;;  %v55_v25 = vld [vmem:[%s4969_s0 + $0x118] sm:$0xff] }
 0x118   :  { %v1507_v29 = vpop.f32.mrf.mxu2  ;;  %v1699_v40 = vpop.f32.mrf.mxu3 }
 0x119   :  { %v1508_v41 = vadd.f32 %v3359_v28, %v1507_v29  ;;  %v1700_v44 = vadd.f32 %v3359_v28, %v1699_v40  ;;  %v3731_v45 = vpop.f32.mrf.mxu0  ;;  %v3733_v46 = vpop.f32.mrf.mxu1  ;;  %v119_v29 = vld [vmem:[%s4969_s0 + $0x318] sm:$0xff] }
 0x11a   :  { %4982 = vst [vmem:[#allocation8_spill] sm:$0xff] %v3731_v45 }
 0x11b   :  { %4983 = vst [vmem:[#allocation9_spill] sm:$0xff] %v3733_v46  ;;  %v1987_v57 = vmax.f32 %v1508_v41, 0.0  ;;  %v2051_v58 = vmax.f32 %v1700_v44, 0.0 }
 0x11c   :  { %2749 = vmatmul.msk.f32.gmra.mxu0 %vm285_vm1, %v54_v47  ;;  %2813 = vmatmul.msk.f32.gmra.mxu1 %vm285_vm1, %v118_v48 }
 0x11d   :  { %v2407_v59 = vsel %vm2099_vm2, %v1987_v57, 0.0  ;;  %v2545_v60 = vsel %vm2099_vm2, %v2051_v58, 0.0  ;;  %2876 = vmatmul.msk.f32.gmra.mxu2 %vm285_vm1, %v181_v49  ;;  %2940 = vmatmul.msk.f32.gmra.mxu3 %vm285_vm1, %v245_v52 }
 0x11e   :  { %v2408_v63 = vadd.f32 %v2407_v59, %v2406_v26  ;;  %v2546_v8 = vadd.f32 %v2545_v60, %v2544_v27  ;;  %v182_v26 = vld [vmem:[%s4969_s0 + $0x510] sm:$0xff] }
 0x11f   :  { %v246_v27 = vld [vmem:[%s4969_s0 + $0x710] sm:$0xff] }
 0x120   :  { %v1510_v11 = vpop.f32.mrf.mxu2  ;;  %v1702_v16 = vpop.f32.mrf.mxu3 }
 0x121   :  { %v1511_v19 = vadd.f32 %v3359_v28, %v1510_v11  ;;  %v1703_v20 = vadd.f32 %v3359_v28, %v1702_v16  ;;  %v3755_v21 = vpop.f32.mrf.mxu0  ;;  %v3757_v24 = vpop.f32.mrf.mxu1  ;;  %v56_v16 = vld [vmem:[%s4969_s0 + $0x120] sm:$0xff] }
 0x122   :  { %4984 = vst [vmem:[#allocation10_spill] sm:$0xff] %v3755_v21 }
 0x123   :  { %4985 = vst [vmem:[#allocation11_spill] sm:$0xff] %v3757_v24  ;;  %v1988_v40 = vmax.f32 %v1511_v19, 0.0  ;;  %v2052_v41 = vmax.f32 %v1703_v20, 0.0  ;;  %v120_v19 = vld [vmem:[%s4969_s0 + $0x320] sm:$0xff] }
 0x124   :  { %2750 = vmatmul.msk.f32.gmra.mxu0 %vm285_vm1, %v55_v25  ;;  %2814 = vmatmul.msk.f32.gmra.mxu1 %vm285_vm1, %v119_v29 }
 0x125   :  { %v2409_v44 = vsel %vm2099_vm2, %v1988_v40, 0.0  ;;  %v2547_v47 = vsel %vm2099_vm2, %v2052_v41, 0.0  ;;  %2877 = vmatmul.msk.f32.gmra.mxu2 %vm285_vm1, %v182_v26  ;;  %2941 = vmatmul.msk.f32.gmra.mxu3 %vm285_vm1, %v246_v27 }
 0x126   :  { %v2410_v48 = vadd.f32 %v2409_v44, %v2408_v63  ;;  %v2548_v49 = vadd.f32 %v2547_v47, %v2546_v8  ;;  %v183_v63 = vld [vmem:[%s4969_s0 + $0x518] sm:$0xff] }
 0x127   :  { %v247_v8 = vld [vmem:[%s4969_s0 + $0x718] sm:$0xff] }
 0x128   :  { %v1513_v52 = vpop.f32.mrf.mxu2  ;;  %v1705_v57 = vpop.f32.mrf.mxu3 }
 0x129   :  { %v1514_v58 = vadd.f32 %v3359_v28, %v1513_v52  ;;  %v1706_v59 = vadd.f32 %v3359_v28, %v1705_v57  ;;  %v3779_v60 = vpop.f32.mrf.mxu0  ;;  %v3781_v11 = vpop.f32.mrf.mxu1 }
 0x12a   :  { %4986 = vst [vmem:[#allocation12_spill] sm:$0xff] %v3779_v60 }
 0x12b   :  { %4987 = vst [vmem:[#allocation13_spill] sm:$0xff] %v3781_v11  ;;  %v1989_v20 = vmax.f32 %v1514_v58, 0.0  ;;  %v2053_v25 = vmax.f32 %v1706_v59, 0.0  ;;  %v57_v59 = vld [vmem:[%s4969_s0 + $0x128] sm:$0xff] }
 0x12c   :  { %2751 = vmatmul.msk.f32.gmra.mxu0 %vm285_vm1, %v56_v16  ;;  %2815 = vmatmul.msk.f32.gmra.mxu1 %vm285_vm1, %v120_v19  ;;  %v121_v16 = vld [vmem:[%s4969_s0 + $0x328] sm:$0xff] }
 0x12d   :  { %v2411_v29 = vsel %vm2099_vm2, %v1989_v20, 0.0  ;;  %v2549_v26 = vsel %vm2099_vm2, %v2053_v25, 0.0  ;;  %2878 = vmatmul.msk.f32.gmra.mxu2 %vm285_vm1, %v183_v63  ;;  %2942 = vmatmul.msk.f32.gmra.mxu3 %vm285_vm1, %v247_v8 }
 0x12e   :  { %v2412_v27 = vadd.f32 %v2411_v29, %v2410_v48  ;;  %v2550_v40 = vadd.f32 %v2549_v26, %v2548_v49  ;;  %v184_v48 = vld [vmem:[%s4969_s0 + $0x520] sm:$0xff] }
 0x12f   :  { %v248_v49 = vld [vmem:[%s4969_s0 + $0x720] sm:$0xff] }
 0x130   :  { %v1516_v41 = vpop.f32.mrf.mxu2  ;;  %v1708_v44 = vpop.f32.mrf.mxu3 }
 0x131   :  { %v1517_v47 = vadd.f32 %v3359_v28, %v1516_v41  ;;  %v1709_v52 = vadd.f32 %v3359_v28, %v1708_v44  ;;  %v3803_v57 = vpop.f32.mrf.mxu0  ;;  %v3805_v58 = vpop.f32.mrf.mxu1 }
 0x132   :  { %4988 = vst [vmem:[#allocation14_spill] sm:$0xff] %v3803_v57 }
 0x133   :  { %4989 = vst [vmem:[#allocation15_spill] sm:$0xff] %v3805_v58  ;;  %v1990_v19 = vmax.f32 %v1517_v47, 0.0  ;;  %v2054_v63 = vmax.f32 %v1709_v52, 0.0 }
 0x134   :  { %2752 = vmatmul.msk.f32.gmra.mxu0 %vm285_vm1, %v57_v59  ;;  %2816 = vmatmul.msk.f32.gmra.mxu1 %vm285_vm1, %v121_v16  ;;  %v58_v16 = vld [vmem:[%s4969_s0 + $0x130] sm:$0xff] }
 0x135   :  { %v2413_v8 = vsel %vm2099_vm2, %v1990_v19, 0.0  ;;  %v2551_v20 = vsel %vm2099_vm2, %v2054_v63, 0.0  ;;  %2879 = vmatmul.msk.f32.gmra.mxu2 %vm285_vm1, %v184_v48  ;;  %2943 = vmatmul.msk.f32.gmra.mxu3 %vm285_vm1, %v248_v49  ;;  %v122_v48 = vld [vmem:[%s4969_s0 + $0x330] sm:$0xff] }
 0x136   :  { %v2414_v25 = vadd.f32 %v2413_v8, %v2412_v27  ;;  %v2552_v29 = vadd.f32 %v2551_v20, %v2550_v40  ;;  %v185_v27 = vld [vmem:[%s4969_s0 + $0x528] sm:$0xff] }
 0x137   :  { %v249_v40 = vld [vmem:[%s4969_s0 + $0x728] sm:$0xff] }
 0x138   :  { %v1519_v26 = vpop.f32.mrf.mxu2  ;;  %v1711_v41 = vpop.f32.mrf.mxu3 }
 0x139   :  { %v1520_v44 = vadd.f32 %v3359_v28, %v1519_v26  ;;  %v1712_v47 = vadd.f32 %v3359_v28, %v1711_v41  ;;  %v3827_v52 = vpop.f32.mrf.mxu0  ;;  %v3829_v59 = vpop.f32.mrf.mxu1 }
 0x13a   :  { %4990 = vst [vmem:[#allocation16_spill] sm:$0xff] %v3827_v52 }
 0x13b   :  { %4991 = vst [vmem:[#allocation17_spill] sm:$0xff] %v3829_v59  ;;  %v1991_v49 = vmax.f32 %v1520_v44, 0.0  ;;  %v2055_v19 = vmax.f32 %v1712_v47, 0.0 }
 0x13c   :  { %2753 = vmatmul.msk.f32.gmra.mxu0 %vm285_vm1, %v58_v16  ;;  %2817 = vmatmul.msk.f32.gmra.mxu1 %vm285_vm1, %v122_v48  ;;  %v59_v48 = vld [vmem:[%s4969_s0 + $0x138] sm:$0xff] }
 0x13d   :  { %v2415_v63 = vsel %vm2099_vm2, %v1991_v49, 0.0  ;;  %v2553_v8 = vsel %vm2099_vm2, %v2055_v19, 0.0  ;;  %2880 = vmatmul.msk.f32.gmra.mxu2 %vm285_vm1, %v185_v27  ;;  %2944 = vmatmul.msk.f32.gmra.mxu3 %vm285_vm1, %v249_v40  ;;  %v123_v27 = vld [vmem:[%s4969_s0 + $0x338] sm:$0xff] }
 0x13e   :  { %v2416_v20 = vadd.f32 %v2415_v63, %v2414_v25  ;;  %v2554_v26 = vadd.f32 %v2553_v8, %v2552_v29  ;;  %v186_v25 = vld [vmem:[%s4969_s0 + $0x530] sm:$0xff] }
 0x140   :  { %v1522_v41 = vpop.f32.mrf.mxu2  ;;  %v1714_v13 = vpop.f32.mrf.mxu3 }
 0x141   :  { %v1523_v12 = vadd.f32 %v3359_v28, %v1522_v41  ;;  %v1715_v44 = vadd.f32 %v3359_v28, %v1714_v13  ;;  %v3851_v47 = vpop.f32.mrf.mxu0  ;;  %v3853_v16 = vpop.f32.mrf.mxu1  ;;  %v250_v13 = vld [vmem:[%s4969_s0 + $0x730] sm:$0xff] }
 0x142   :  { %4992 = vst [vmem:[#allocation18_spill] sm:$0xff] %v3851_v47 }
 0x143   :  { %4993 = vst [vmem:[#allocation19_spill] sm:$0xff] %v3853_v16  ;;  %v1992_v29 = vmax.f32 %v1523_v12, 0.0  ;;  %v2056_v40 = vmax.f32 %v1715_v44, 0.0 }
 0x144   :  { %2754 = vmatmul.msk.f32.gmra.mxu0 %vm285_vm1, %v59_v48  ;;  %2818 = vmatmul.msk.f32.gmra.mxu1 %vm285_vm1, %v123_v27  ;;  %v60_v27 = vld [vmem:[%s4969_s0 + $0x140] sm:$0xff] }
 0x145   :  { %v2417_v49 = vsel %vm2099_vm2, %v1992_v29, 0.0  ;;  %v2555_v19 = vsel %vm2099_vm2, %v2056_v40, 0.0  ;;  %2881 = vmatmul.msk.f32.gmra.mxu2 %vm285_vm1, %v186_v25  ;;  %2945 = vmatmul.msk.f32.gmra.mxu3 %vm285_vm1, %v250_v13  ;;  %v124_v25 = vld [vmem:[%s4969_s0 + $0x340] sm:$0xff] }
 0x146   :  { %v2418_v63 = vadd.f32 %v2417_v49, %v2416_v20  ;;  %v2556_v8 = vadd.f32 %v2555_v19, %v2554_v26  ;;  %v187_v20 = vld [vmem:[%s4969_s0 + $0x538] sm:$0xff] }
 0x147   :  { %v251_v26 = vld [vmem:[%s4969_s0 + $0x738] sm:$0xff] }
 0x148   :  { %v1525_v41 = vpop.f32.mrf.mxu2  ;;  %v1717_v16 = vpop.f32.mrf.mxu3 }
 0x149   :  { %v1526_v47 = vadd.f32 %v3359_v28, %v1525_v41  ;;  %v1718_v12 = vadd.f32 %v3359_v28, %v1717_v16  ;;  %v3875_v44 = vpop.f32.mrf.mxu0  ;;  %v3877_v48 = vpop.f32.mrf.mxu1 }
 0x14a   :  { %4994 = vst [vmem:[#allocation20_spill] sm:$0xff] %v3875_v44 }
 0x14b   :  { %4995 = vst [vmem:[#allocation21_spill] sm:$0xff] %v3877_v48  ;;  %v1993_v16 = vmax.f32 %v1526_v47, 0.0  ;;  %v2057_v13 = vmax.f32 %v1718_v12, 0.0 }
 0x14c   :  { %2755 = vmatmul.msk.f32.gmra.mxu0 %vm285_vm1, %v60_v27  ;;  %2819 = vmatmul.msk.f32.gmra.mxu1 %vm285_vm1, %v124_v25  ;;  %v61_v25 = vld [vmem:[%s4969_s0 + $0x148] sm:$0xff] }
 0x14d   :  { %v2419_v29 = vsel %vm2099_vm2, %v1993_v16, 0.0  ;;  %v2557_v40 = vsel %vm2099_vm2, %v2057_v13, 0.0  ;;  %2882 = vmatmul.msk.f32.gmra.mxu2 %vm285_vm1, %v187_v20  ;;  %2946 = vmatmul.msk.f32.gmra.mxu3 %vm285_vm1, %v251_v26  ;;  %v125_v20 = vld [vmem:[%s4969_s0 + $0x348] sm:$0xff] }
 0x14e   :  { %v2420_v49 = vadd.f32 %v2419_v29, %v2418_v63  ;;  %v2558_v19 = vadd.f32 %v2557_v40, %v2556_v8  ;;  %v188_v63 = vld [vmem:[%s4969_s0 + $0x540] sm:$0xff] }
 0x14f   :  { %v252_v8 = vld [vmem:[%s4969_s0 + $0x740] sm:$0xff] }
 0x150   :  { %v1528_v41 = vpop.f32.mrf.mxu2  ;;  %v1720_v48 = vpop.f32.mrf.mxu3 }
 0x151   :  { %v1529_v44 = vadd.f32 %v3359_v28, %v1528_v41  ;;  %v1721_v47 = vadd.f32 %v3359_v28, %v1720_v48  ;;  %v3899_v12 = vpop.f32.mrf.mxu0  ;;  %v3901_v27 = vpop.f32.mrf.mxu1 }
 0x152   :  { %4996 = vst [vmem:[#allocation22_spill] sm:$0xff] %v3899_v12 }
 0x153   :  { %4997 = vst [vmem:[#allocation23_spill] sm:$0xff] %v3901_v27  ;;  %v1994_v48 = vmax.f32 %v1529_v44, 0.0  ;;  %v2058_v26 = vmax.f32 %v1721_v47, 0.0 }
 0x154   :  { %2756 = vmatmul.msk.f32.gmra.mxu0 %vm285_vm1, %v61_v25  ;;  %2820 = vmatmul.msk.f32.gmra.mxu1 %vm285_vm1, %v125_v20  ;;  %v62_v20 = vld [vmem:[%s4969_s0 + $0x150] sm:$0xff] }
 0x155   :  { %v2421_v16 = vsel %vm2099_vm2, %v1994_v48, 0.0  ;;  %v2559_v13 = vsel %vm2099_vm2, %v2058_v26, 0.0  ;;  %2883 = vmatmul.msk.f32.gmra.mxu2 %vm285_vm1, %v188_v63  ;;  %2947 = vmatmul.msk.f32.gmra.mxu3 %vm285_vm1, %v252_v8  ;;  %v126_v63 = vld [vmem:[%s4969_s0 + $0x350] sm:$0xff] }
 0x156   :  { %v2422_v29 = vadd.f32 %v2421_v16, %v2420_v49  ;;  %v2560_v40 = vadd.f32 %v2559_v13, %v2558_v19  ;;  %v189_v49 = vld [vmem:[%s4969_s0 + $0x548] sm:$0xff] }
 0x157   :  { %v253_v19 = vld [vmem:[%s4969_s0 + $0x748] sm:$0xff] }
 0x158   :  { %v1531_v41 = vpop.f32.mrf.mxu2  ;;  %v1723_v27 = vpop.f32.mrf.mxu3 }
 0x159   :  { %v1532_v12 = vadd.f32 %v3359_v28, %v1531_v41  ;;  %v1724_v44 = vadd.f32 %v3359_v28, %v1723_v27  ;;  %v3923_v47 = vpop.f32.mrf.mxu0  ;;  %v3925_v25 = vpop.f32.mrf.mxu1 }
 0x15a   :  { %4998 = vst [vmem:[#allocation24_spill] sm:$0xff] %v3923_v47 }
 0x15b   :  { %4999 = vst [vmem:[#allocation25_spill] sm:$0xff] %v3925_v25  ;;  %v1995_v27 = vmax.f32 %v1532_v12, 0.0  ;;  %v2059_v8 = vmax.f32 %v1724_v44, 0.0 }
 0x15c   :  { %2757 = vmatmul.msk.f32.gmra.mxu0 %vm285_vm1, %v62_v20  ;;  %2821 = vmatmul.msk.f32.gmra.mxu1 %vm285_vm1, %v126_v63  ;;  %v63_v63 = vld [vmem:[%s4969_s0 + $0x158] sm:$0xff] }
 0x15d   :  { %v2423_v48 = vsel %vm2099_vm2, %v1995_v27, 0.0  ;;  %v2561_v26 = vsel %vm2099_vm2, %v2059_v8, 0.0  ;;  %2884 = vmatmul.msk.f32.gmra.mxu2 %vm285_vm1, %v189_v49  ;;  %2948 = vmatmul.msk.f32.gmra.mxu3 %vm285_vm1, %v253_v19  ;;  %v127_v49 = vld [vmem:[%s4969_s0 + $0x358] sm:$0xff] }
 0x15e   :  { %v2424_v16 = vadd.f32 %v2423_v48, %v2422_v29  ;;  %v2562_v13 = vadd.f32 %v2561_v26, %v2560_v40  ;;  %v190_v29 = vld [vmem:[%s4969_s0 + $0x550] sm:$0xff] }
 0x160   :  { %v1534_v41 = vpop.f32.mrf.mxu2  ;;  %v1726_v25 = vpop.f32.mrf.mxu3 }
 0x161   :  { %v1535_v47 = vadd.f32 %v3359_v28, %v1534_v41  ;;  %v1727_v12 = vadd.f32 %v3359_v28, %v1726_v25  ;;  %v3947_v44 = vpop.f32.mrf.mxu0  ;;  %v3949_v20 = vpop.f32.mrf.mxu1  ;;  %v254_v28 = vld [vmem:[%s4969_s0 + $0x750] sm:$0xff] }
 0x162   :  { %5000 = vst [vmem:[#allocation26_spill] sm:$0xff] %v3947_v44 }
 0x163   :  { %5001 = vst [vmem:[#allocation27_spill] sm:$0xff] %v3949_v20  ;;  %v1996_v40 = vmax.f32 %v1535_v47, 0.0  ;;  %v2060_v25 = vmax.f32 %v1727_v12, 0.0  ;;  %v3972_v47 = vld [vmem:[%s4970_s2] ss:$0 sm:$0xff] }
 0x164   :  { %2758 = vmatmul.msk.f32.gmra.mxu0 %vm285_vm1, %v63_v63  ;;  %2822 = vmatmul.msk.f32.gmra.mxu1 %vm285_vm1, %v127_v49 }
 0x165   :  { %v2425_v19 = vsel %vm2099_vm2, %v1996_v40, 0.0  ;;  %v2563_v27 = vsel %vm2099_vm2, %v2060_v25, 0.0  ;;  %2885 = vmatmul.msk.f32.gmra.mxu2 %vm285_vm1, %v190_v29  ;;  %2949 = vmatmul.msk.f32.gmra.mxu3 %vm285_vm1, %v254_v28  ;;  %v191_v29 = vld [vmem:[%s4969_s0 + $0x558] sm:$0xff] }
 0x166   :  { %v2426_v8 = vadd.f32 %v2425_v19, %v2424_v16  ;;  %v2564_v48 = vadd.f32 %v2563_v27, %v2562_v13  ;;  %v64_v16 = vld [vmem:[%s4969_s0 + $0x160] sm:$0xff]  ;;  %v255_v28 = vld [vmem:[%s4969_s0 + $0x758] sm:$0xff] }
 0x167   :  { %v128_v13 = vld [vmem:[%s4969_s0 + $0x360] sm:$0xff] }
 0x168   :  { %v1537_v26 = vpop.f32.mrf.mxu2  ;;  %v1729_v41 = vpop.f32.mrf.mxu3 }
 0x169   :  { %v1538_v12 = vadd.f32 %v3972_v47, %v1537_v26  ;;  %v1730_v63 = vadd.f32 %v3972_v47, %v1729_v41  ;;  %v3976_v49 = vpop.f32.mrf.mxu0  ;;  %v3978_v40 = vpop.f32.mrf.mxu1 }
 0x16a   :  { %5002 = vst [vmem:[#allocation28_spill] sm:$0xff] %v3976_v49 }
 0x16b   :  { %5003 = vst [vmem:[#allocation29_spill] sm:$0xff] %v3978_v40  ;;  %v1997_v25 = vmax.f32 %v1538_v12, 0.0  ;;  %v2061_v19 = vmax.f32 %v1730_v63, 0.0 }
 0x16c   :  { %2759 = vmatmul.msk.f32.gmra.mxu0 %vm285_vm1, %v64_v16  ;;  %2823 = vmatmul.msk.f32.gmra.mxu1 %vm285_vm1, %v128_v13  ;;  %v65_v13 = vld [vmem:[%s4969_s0 + $0x168] sm:$0xff] }
 0x16d   :  { %v2427_v27 = vsel %vm2099_vm2, %v1997_v25, 0.0  ;;  %v2565_v26 = vsel %vm2099_vm2, %v2061_v19, 0.0  ;;  %2886 = vmatmul.msk.f32.gmra.mxu2 %vm285_vm1, %v191_v29  ;;  %2950 = vmatmul.msk.f32.gmra.mxu3 %vm285_vm1, %v255_v28  ;;  %v129_v29 = vld [vmem:[%s4969_s0 + $0x368] sm:$0xff] }
 0x16e   :  { %v2428_v41 = vadd.f32 %v2427_v27, %v2426_v8  ;;  %v2566_v40 = vadd.f32 %v2565_v26, %v2564_v48  ;;  %v192_v8 = vld [vmem:[%s4969_s0 + $0x560] sm:$0xff] }
 0x170   :  { %v1540_v49 = vpop.f32.mrf.mxu2  ;;  %v1732_v20 = vpop.f32.mrf.mxu3 }
 0x171   :  { %v1541_v44 = vadd.f32 %v3972_v47, %v1540_v49  ;;  %v1733_v12 = vadd.f32 %v3972_v47, %v1732_v20  ;;  %v4000_v63 = vpop.f32.mrf.mxu0  ;;  %v4002_v16 = vpop.f32.mrf.mxu1  ;;  %v256_v20 = vld [vmem:[%s4969_s0 + $0x760] sm:$0xff] }
 0x172   :  { %5004 = vst [vmem:[#allocation30_spill] sm:$0xff] %v4000_v63 }
 0x173   :  { %5005 = vst [vmem:[#allocation31_spill] sm:$0xff] %v4002_v16  ;;  %v1998_v48 = vmax.f32 %v1541_v44, 0.0  ;;  %v2062_v49 = vmax.f32 %v1733_v12, 0.0 }
 0x174   :  { %2760 = vmatmul.msk.f32.gmra.mxu0 %vm285_vm1, %v65_v13  ;;  %2824 = vmatmul.msk.f32.gmra.mxu1 %vm285_vm1, %v129_v29  ;;  %v66_v29 = vld [vmem:[%s4969_s0 + $0x170] sm:$0xff] }
 0x175   :  { %v2429_v28 = vsel %vm2099_vm2, %v1998_v48, 0.0  ;;  %v2567_v25 = vsel %vm2099_vm2, %v2062_v49, 0.0  ;;  %2887 = vmatmul.msk.f32.gmra.mxu2 %vm285_vm1, %v192_v8  ;;  %2951 = vmatmul.msk.f32.gmra.mxu3 %vm285_vm1, %v256_v20  ;;  %v130_v8 = vld [vmem:[%s4969_s0 + $0x370] sm:$0xff] }
 0x176   :  { %v2430_v19 = vadd.f32 %v2429_v28, %v2428_v41  ;;  %v2568_v27 = vadd.f32 %v2567_v25, %v2566_v40  ;;  %v193_v40 = vld [vmem:[%s4969_s0 + $0x568] sm:$0xff] }
 0x177   :  { %v257_v41 = vld [vmem:[%s4969_s0 + $0x768] sm:$0xff] }
 0x178   :  { %v1543_v26 = vpop.f32.mrf.mxu2  ;;  %v1735_v16 = vpop.f32.mrf.mxu3 }
 0x179   :  { %v1544_v63 = vadd.f32 %v3972_v47, %v1543_v26  ;;  %v1736_v44 = vadd.f32 %v3972_v47, %v1735_v16  ;;  %v4024_v12 = vpop.f32.mrf.mxu0  ;;  %v4026_v13 = vpop.f32.mrf.mxu1 }
 0x17a   :  { %5006 = vst [vmem:[#allocation32_spill] sm:$0xff] %v4024_v12 }
 0x17b   :  { %5007 = vst [vmem:[#allocation33_spill] sm:$0xff] %v4026_v13  ;;  %v1999_v16 = vmax.f32 %v1544_v63, 0.0  ;;  %v2063_v20 = vmax.f32 %v1736_v44, 0.0 }
 0x17c   :  { %2761 = vmatmul.msk.f32.gmra.mxu0 %vm285_vm1, %v66_v29  ;;  %2825 = vmatmul.msk.f32.gmra.mxu1 %vm285_vm1, %v130_v8  ;;  %v67_v8 = vld [vmem:[%s4969_s0 + $0x178] sm:$0xff] }
 0x17d   :  { %v2431_v48 = vsel %vm2099_vm2, %v1999_v16, 0.0  ;;  %v2569_v49 = vsel %vm2099_vm2, %v2063_v20, 0.0  ;;  %2888 = vmatmul.msk.f32.gmra.mxu2 %vm285_vm1, %v193_v40  ;;  %2952 = vmatmul.msk.f32.gmra.mxu3 %vm285_vm1, %v257_v41  ;;  %v131_v40 = vld [vmem:[%s4969_s0 + $0x378] sm:$0xff] }
 0x17e   :  { %v2432_v28 = vadd.f32 %v2431_v48, %v2430_v19  ;;  %v2570_v25 = vadd.f32 %v2569_v49, %v2568_v27  ;;  %v194_v19 = vld [vmem:[%s4969_s0 + $0x570] sm:$0xff] }
 0x17f   :  { %v258_v27 = vld [vmem:[%s4969_s0 + $0x770] sm:$0xff] }
 0x180   :  { %v1546_v26 = vpop.f32.mrf.mxu2  ;;  %v1738_v13 = vpop.f32.mrf.mxu3 }
 0x181   :  { %v1547_v12 = vadd.f32 %v3972_v47, %v1546_v26  ;;  %v1739_v63 = vadd.f32 %v3972_v47, %v1738_v13  ;;  %v4048_v44 = vpop.f32.mrf.mxu0  ;;  %v4050_v29 = vpop.f32.mrf.mxu1 }
 0x182   :  { %5008 = vst [vmem:[#allocation34_spill] sm:$0xff] %v4048_v44 }
 0x183   :  { %5009 = vst [vmem:[#allocation35_spill] sm:$0xff] %v4050_v29  ;;  %v2000_v13 = vmax.f32 %v1547_v12, 0.0  ;;  %v2064_v41 = vmax.f32 %v1739_v63, 0.0 }
 0x184   :  { %2762 = vmatmul.msk.f32.gmra.mxu0 %vm285_vm1, %v67_v8  ;;  %2826 = vmatmul.msk.f32.gmra.mxu1 %vm285_vm1, %v131_v40  ;;  %v68_v40 = vld [vmem:[%s4969_s0 + $0x180] sm:$0xff] }
 0x185   :  { %v2433_v16 = vsel %vm2099_vm2, %v2000_v13, 0.0  ;;  %v2571_v20 = vsel %vm2099_vm2, %v2064_v41, 0.0  ;;  %2889 = vmatmul.msk.f32.gmra.mxu2 %vm285_vm1, %v194_v19  ;;  %2953 = vmatmul.msk.f32.gmra.mxu3 %vm285_vm1, %v258_v27  ;;  %v132_v19 = vld [vmem:[%s4969_s0 + $0x380] sm:$0xff] }
 0x186   :  { %v2434_v48 = vadd.f32 %v2433_v16, %v2432_v28  ;;  %v2572_v49 = vadd.f32 %v2571_v20, %v2570_v25  ;;  %v195_v28 = vld [vmem:[%s4969_s0 + $0x578] sm:$0xff] }
 0x187   :  { %v259_v25 = vld [vmem:[%s4969_s0 + $0x778] sm:$0xff] }
 0x188   :  { %v1549_v26 = vpop.f32.mrf.mxu2  ;;  %v1741_v29 = vpop.f32.mrf.mxu3 }
 0x189   :  { %v1550_v44 = vadd.f32 %v3972_v47, %v1549_v26  ;;  %v1742_v12 = vadd.f32 %v3972_v47, %v1741_v29  ;;  %v4072_v63 = vpop.f32.mrf.mxu0  ;;  %v4074_v8 = vpop.f32.mrf.mxu1 }
 0x18b   :  { %v2001_v29 = vmax.f32 %v1550_v44, 0.0  ;;  %v2065_v27 = vmax.f32 %v1742_v12, 0.0 }
 0x18c   :  { %2763 = vmatmul.msk.f32.gmra.mxu0 %vm285_vm1, %v68_v40  ;;  %2827 = vmatmul.msk.f32.gmra.mxu1 %vm285_vm1, %v132_v19  ;;  %v69_v19 = vld [vmem:[%s4969_s0 + $0x188] sm:$0xff] }
 0x18d   :  { %v2435_v13 = vsel %vm2099_vm2, %v2001_v29, 0.0  ;;  %v2573_v41 = vsel %vm2099_vm2, %v2065_v27, 0.0  ;;  %2890 = vmatmul.msk.f32.gmra.mxu2 %vm285_vm1, %v195_v28  ;;  %2954 = vmatmul.msk.f32.gmra.mxu3 %vm285_vm1, %v259_v25  ;;  %v133_v28 = vld [vmem:[%s4969_s0 + $0x388] sm:$0xff] }
 0x18e   :  { %v2436_v16 = vadd.f32 %v2435_v13, %v2434_v48  ;;  %v2574_v20 = vadd.f32 %v2573_v41, %v2572_v49  ;;  %v196_v48 = vld [vmem:[%s4969_s0 + $0x580] sm:$0xff] }
 0x190   :  { %v1552_v26 = vpop.f32.mrf.mxu2  ;;  %v1744_v59 = vpop.f32.mrf.mxu3 }
 0x191   :  { %v1553_v52 = vadd.f32 %v3972_v47, %v1552_v26  ;;  %v1745_v44 = vadd.f32 %v3972_v47, %v1744_v59  ;;  %v4096_v12 = vpop.f32.mrf.mxu0  ;;  %v4098_v40 = vpop.f32.mrf.mxu1  ;;  %v260_v59 = vld [vmem:[%s4969_s0 + $0x780] sm:$0xff] }
 0x193   :  { %v2002_v49 = vmax.f32 %v1553_v52, 0.0  ;;  %v2066_v25 = vmax.f32 %v1745_v44, 0.0 }
 0x194   :  { %2764 = vmatmul.msk.f32.gmra.mxu0 %vm285_vm1, %v69_v19  ;;  %2828 = vmatmul.msk.f32.gmra.mxu1 %vm285_vm1, %v133_v28  ;;  %v70_v19 = vld [vmem:[%s4969_s0 + $0x190] sm:$0xff] }
 0x195   :  { %v2437_v29 = vsel %vm2099_vm2, %v2002_v49, 0.0  ;;  %v2575_v27 = vsel %vm2099_vm2, %v2066_v25, 0.0  ;;  %2891 = vmatmul.msk.f32.gmra.mxu2 %vm285_vm1, %v196_v48  ;;  %2955 = vmatmul.msk.f32.gmra.mxu3 %vm285_vm1, %v260_v59  ;;  %v134_v28 = vld [vmem:[%s4969_s0 + $0x390] sm:$0xff] }
 0x196   :  { %v4118_v13 = vadd.f32 %v2437_v29, %v2436_v16  ;;  %v4120_v41 = vadd.f32 %v2575_v27, %v2574_v20  ;;  %v197_v16 = vld [vmem:[%s4969_s0 + $0x588] sm:$0xff] }
 0x197   :  { %v261_v20 = vld [vmem:[%s4969_s0 + $0x788] sm:$0xff] }
 0x198   :  { %5010 = vst [vmem:[#allocation36_spill] sm:$0xff] %v4118_v13  ;;  %v1555_v26 = vpop.f32.mrf.mxu2  ;;  %v1747_v58 = vpop.f32.mrf.mxu3 }
 0x199   :  { %5011 = vst [vmem:[#allocation37_spill] sm:$0xff] %v4120_v41  ;;  %v4122_v52 = vpop.f32.mrf.mxu0  ;;  %v4124_v44 = vpop.f32.mrf.mxu1  ;;  %v1556_v48 = vadd.f32 %v3972_v47, %v1555_v26  ;;  %v1748_v59 = vadd.f32 %v3972_v47, %v1747_v58  ;;  %v71_v58 = vld [vmem:[%s4969_s0 + $0x198] sm:$0xff] }
 0x19a   :  { %v135_v26 = vld [vmem:[%s4969_s0 + $0x398] sm:$0xff] }
 0x19b   :  { %v2003_v29 = vmax.f32 %v1556_v48, 0.0  ;;  %v2067_v27 = vmax.f32 %v1748_v59, 0.0 }
 0x19c   :  { %2765 = vmatmul.msk.f32.gmra.mxu0 %vm285_vm1, %v70_v19  ;;  %2829 = vmatmul.msk.f32.gmra.mxu1 %vm285_vm1, %v134_v28  ;;  %v198_v28 = vld [vmem:[%s4969_s0 + $0x590] sm:$0xff] }
 0x19d   :  { %2892 = vmatmul.msk.f32.gmra.mxu2 %vm285_vm1, %v197_v16  ;;  %2956 = vmatmul.msk.f32.gmra.mxu3 %vm285_vm1, %v261_v20  ;;  %v262_v16 = vld [vmem:[%s4969_s0 + $0x790] sm:$0xff]  ;;  %v2445_v59 = vsel %vm2099_vm2, %v2003_v29, 0.0 }
 0x1a0   :  { %v1558_v49 = vpop.f32.mrf.mxu2  ;;  %v1750_v25 = vpop.f32.mrf.mxu3 }
 0x1a1   :  { %v1559_v41 = vadd.f32 %v3972_v47, %v1558_v49  ;;  %v1751_v13 = vadd.f32 %v3972_v47, %v1750_v25  ;;  %v4146_v57 = vpop.f32.mrf.mxu0  ;;  %v4148_v19 = vpop.f32.mrf.mxu1  ;;  %v2583_v49 = vsel %vm2099_vm2, %v2067_v27, 0.0  ;;  %v72_v27 = vld [vmem:[%s4969_s0 + $0x1a0] sm:$0xff] }
 0x1a3   :  { %v2004_v20 = vmax.f32 %v1559_v41, 0.0  ;;  %v2068_v48 = vmax.f32 %v1751_v13, 0.0 }
 0x1a4   :  { %2766 = vmatmul.msk.f32.gmra.mxu0 %vm285_vm1, %v71_v58  ;;  %2830 = vmatmul.msk.f32.gmra.mxu1 %vm285_vm1, %v135_v26 }
 0x1a5   :  { %v2446_v25 = vsel %vm2099_vm2, %v2004_v20, 0.0  ;;  %v2584_v11 = vsel %vm2099_vm2, %v2068_v48, 0.0  ;;  %2893 = vmatmul.msk.f32.gmra.mxu2 %vm285_vm1, %v198_v28  ;;  %2957 = vmatmul.msk.f32.gmra.mxu3 %vm285_vm1, %v262_v16  ;;  %v136_v28 = vld [vmem:[%s4969_s0 + $0x3a0] sm:$0xff]  ;;  %v263_v16 = vld [vmem:[%s4969_s0 + $0x798] sm:$0xff] }
 0x1a6   :  { %v2447_v60 = vadd.f32 %v2446_v25, %v2445_v59  ;;  %v2585_v24 = vadd.f32 %v2584_v11, %v2583_v49  ;;  %v199_v11 = vld [vmem:[%s4969_s0 + $0x598] sm:$0xff] }
 0x1a8   :  { %v1561_v41 = vpop.f32.mrf.mxu2  ;;  %v1753_v13 = vpop.f32.mrf.mxu3 }
 0x1a9   :  { %v1562_v58 = vadd.f32 %v3972_v47, %v1561_v41  ;;  %v1754_v26 = vadd.f32 %v3972_v47, %v1753_v13  ;;  %v4172_v21 = vpop.f32.mrf.mxu0  ;;  %v4174_v29 = vpop.f32.mrf.mxu1 }
 0x1ab   :  { %v2005_v20 = vmax.f32 %v1562_v58, 0.0  ;;  %v2069_v48 = vmax.f32 %v1754_v26, 0.0 }
 0x1ac   :  { %2767 = vmatmul.msk.f32.gmra.mxu0 %vm285_vm1, %v72_v27  ;;  %2831 = vmatmul.msk.f32.gmra.mxu1 %vm285_vm1, %v136_v28  ;;  %v73_v28 = vld [vmem:[%s4969_s0 + $0x1a8] sm:$0xff] }
 0x1ad   :  { %v2448_v59 = vsel %vm2099_vm2, %v2005_v20, 0.0  ;;  %v2586_v49 = vsel %vm2099_vm2, %v2069_v48, 0.0  ;;  %2894 = vmatmul.msk.f32.gmra.mxu2 %vm285_vm1, %v199_v11  ;;  %2958 = vmatmul.msk.f32.gmra.mxu3 %vm285_vm1, %v263_v16  ;;  %v137_v11 = vld [vmem:[%s4969_s0 + $0x3a8] sm:$0xff]  ;;  %v264_v16 = vld [vmem:[%s4969_s0 + $0x7a0] sm:$0xff] }
 0x1ae   :  { %v2449_v25 = vadd.f32 %v2448_v59, %v2447_v60  ;;  %v2587_v41 = vadd.f32 %v2586_v49, %v2585_v24  ;;  %v1364_v24 = vadd.f32 %v3972_v47, %v4074_v8  ;;  %v1367_v60 = vadd.f32 %v3972_v47, %v4098_v40 }
 0x1af   :  { %v1172_v8 = vadd.f32 %v3972_v47, %v4072_v63  ;;  %v1175_v40 = vadd.f32 %v3972_v47, %v4096_v12  ;;  %v1370_v63 = vadd.f32 %v3972_v47, %v4124_v44 }
 0x1b0   :  { %v1564_v13 = vpop.f32.mrf.mxu2  ;;  %v1756_v46 = vpop.f32.mrf.mxu3 }
 0x1b1   :  { %v1565_v45 = vadd.f32 %v3972_v47, %v1564_v13  ;;  %v1757_v58 = vadd.f32 %v3972_v47, %v1756_v46  ;;  %v4196_v26 = vpop.f32.mrf.mxu0  ;;  %v4198_v27 = vpop.f32.mrf.mxu1  ;;  %v200_v46 = vld [vmem:[%s4969_s0 + $0x5a0] sm:$0xff]  ;;  %v1940_v13 = vmax.f32 %v1367_v60, 0.0  ;;  %v1875_v2 = vmax.f32 %v1172_v8, 0.0 }
 0x1b2   :  { %v1941_v8 = vmax.f32 %v1370_v63, 0.0 }
 0x1b3   :  { %v2006_v20 = vmax.f32 %v1565_v45, 0.0  ;;  %v2070_v48 = vmax.f32 %v1757_v58, 0.0  ;;  %v1939_v45 = vmax.f32 %v1364_v24, 0.0  ;;  %v265_v24 = vld [vmem:[%s4969_s0 + $0x7a8] sm:$0xff] }
 0x1b4   :  { %2768 = vmatmul.msk.f32.gmra.mxu0 %vm285_vm1, %v73_v28  ;;  %2832 = vmatmul.msk.f32.gmra.mxu1 %vm285_vm1, %v137_v11  ;;  %v1178_v11 = vadd.f32 %v3972_v47, %v4122_v52  ;;  %v138_v52 = vld [vmem:[%s4969_s0 + $0x3b0] sm:$0xff] }
 0x1b5   :  { %v2450_v59 = vsel %vm2099_vm2, %v2006_v20, 0.0  ;;  %v2588_v49 = vsel %vm2099_vm2, %v2070_v48, 0.0  ;;  %2895 = vmatmul.msk.f32.gmra.mxu2 %vm285_vm1, %v200_v46  ;;  %2959 = vmatmul.msk.f32.gmra.mxu3 %vm285_vm1, %v264_v16  ;;  %v1876_v20 = vmax.f32 %v1175_v40, 0.0  ;;  %v2307_v44 = vsel %vm2099_vm2, %v1939_v45, 0.0 }
 0x1b6   :  { %v2451_v58 = vadd.f32 %v2450_v59, %v2449_v25  ;;  %v2589_v28 = vadd.f32 %v2588_v49, %v2587_v41  ;;  %v74_v25 = vld [vmem:[%s4969_s0 + $0x1b0] sm:$0xff]  ;;  %v2308_v41 = vsel %vm2099_vm2, %v1940_v13, 0.0  ;;  %v1877_v60 = vmax.f32 %v1178_v11, 0.0 }
 0x1b7   :  { %v1181_v49 = vadd.f32 %v3972_v47, %v4146_v57  ;;  %v1373_v45 = vadd.f32 %v3972_v47, %v4148_v19  ;;  %v2169_v13 = vsel %vm2099_vm2, %v1875_v2, 0.0  ;;  %v2309_v57 = vadd.f32 %v2308_v41, %v2307_v44  ;;  %v75_v44 = vld [vmem:[%s4969_s0 + $0x1b8] sm:$0xff] }
 0x1b8   :  { %v1567_v3 = vpop.f32.mrf.mxu2  ;;  %v1759_v12 = vpop.f32.mrf.mxu3  ;;  %v2172_v19 = vsel %vm2099_vm2, %v1877_v60, 0.0  ;;  %v1184_v2 = vadd.f32 %v3972_v47, %v4172_v21  ;;  %v139_v21 = vld [vmem:[%s4969_s0 + $0x3b8] sm:$0xff]  ;;  %v202_v60 = vld [vmem:[%s4969_s0 + $0x5b0] sm:$0xff] }
 0x1b9   :  { %v1568_v48 = vadd.f32 %v3972_v47, %v1567_v3  ;;  %v1760_v46 = vadd.f32 %v3972_v47, %v1759_v12  ;;  %v1189_v39 = vpop.f32.mrf.mxu0  ;;  %v1381_v16 = vpop.f32.mrf.mxu1  ;;  %v201_v3 = vld [vmem:[%s4969_s0 + $0x5a8] sm:$0xff]  ;;  %v2170_v12 = vsel %vm2099_vm2, %v1876_v20, 0.0  ;;  %v1376_v20 = vadd.f32 %v3972_v47, %v4174_v29 }
 0x1bb   :  { %v2007_v40 = vmax.f32 %v1568_v48, 0.0  ;;  %v2071_v59 = vmax.f32 %v1760_v46, 0.0  ;;  %v2310_v46 = vsel %vm2099_vm2, %v1941_v8, 0.0  ;;  %v266_v8 = vld [vmem:[%s4969_s0 + $0x7b0] sm:$0xff] }
 0x1bc   :  { %2769 = vmatmul.msk.f32.gmra.mxu0 %vm285_vm1, %v74_v25  ;;  %2833 = vmatmul.msk.f32.gmra.mxu1 %vm285_vm1, %v138_v52  ;;  %v2171_v25 = vadd.f32 %v2170_v12, %v2169_v13  ;;  %v1878_v52 = vmax.f32 %v1181_v49, 0.0  ;;  %v2311_v41 = vadd.f32 %v2310_v46, %v2309_v57  ;;  %v1879_v49 = vmax.f32 %v1184_v2, 0.0 }
 0x1bd   :  { %v2452_v30 = vsel %vm2099_vm2, %v2007_v40, 0.0  ;;  %v2590_v11 = vsel %vm2099_vm2, %v2071_v59, 0.0  ;;  %2896 = vmatmul.msk.f32.gmra.mxu2 %vm285_vm1, %v201_v3  ;;  %2960 = vmatmul.msk.f32.gmra.mxu3 %vm285_vm1, %v265_v24  ;;  %v1942_v40 = vmax.f32 %v1373_v45, 0.0  ;;  %v1943_v45 = vmax.f32 %v1376_v20, 0.0 }
 0x1be   :  { %v2453_v63 = vadd.f32 %v2452_v30, %v2451_v58  ;;  %v2591_v48 = vadd.f32 %v2590_v11, %v2589_v28  ;;  %v2173_v29 = vadd.f32 %v2172_v19, %v2171_v25  ;;  %v2174_v11 = vsel %vm2099_vm2, %v1878_v52, 0.0 }
 0x1bf   :  { %v1187_v19 = vadd.f32 %v3972_v47, %v4196_v26  ;;  %v1379_v57 = vadd.f32 %v3972_v47, %v4198_v27  ;;  %v1190_v46 = vadd.f32 %v3972_v47, %v1189_v39  ;;  %v1382_v2 = vadd.f32 %v3972_v47, %v1381_v16 }
 0x1c0   :  { %v1570_v59 = vpop.f32.mrf.mxu2  ;;  %v1762_v3 = vpop.f32.mrf.mxu3 }
 0x1c1   :  { %v1571_v24 = vadd.f32 %v3972_v47, %v1570_v59  ;;  %v1763_v30 = vadd.f32 %v3972_v47, %v1762_v3  ;;  %v1192_v58 = vpop.f32.mrf.mxu0  ;;  %v1384_v28 = vpop.f32.mrf.mxu1  ;;  %v2312_v59 = vsel %vm2099_vm2, %v1942_v40, 0.0  ;;  %v2175_v40 = vadd.f32 %v2174_v11, %v2173_v29  ;;  %v267_v11 = vld [vmem:[%s4969_s0 + $0x7b8] sm:$0xff] }
 0x1c2   :  { %v2313_v27 = vadd.f32 %v2312_v59, %v2311_v41  ;;  %v2176_v3 = vsel %vm2099_vm2, %v1879_v49, 0.0  ;;  %v1944_v39 = vmax.f32 %v1379_v57, 0.0  ;;  %v1193_v16 = vadd.f32 %v3972_v47, %v1192_v58  ;;  %v76_v41 = vld [vmem:[%s4969_s0 + $0x1c0] sm:$0xff] }
 0x1c3   :  { %v2008_v13 = vmax.f32 %v1571_v24, 0.0  ;;  %v2072_v12 = vmax.f32 %v1763_v30, 0.0  ;;  %v2314_v24 = vsel %vm2099_vm2, %v1943_v45, 0.0  ;;  %v1880_v30 = vmax.f32 %v1187_v19, 0.0  ;;  %v140_v58 = vld [vmem:[%s4969_s0 + $0x3c0] sm:$0xff]  ;;  %v203_v45 = vld [vmem:[%s4969_s0 + $0x5b8] sm:$0xff] }
 0x1c4   :  { %2770 = vmatmul.msk.f32.gmra.mxu0 %vm285_vm1, %v75_v44  ;;  %2834 = vmatmul.msk.f32.gmra.mxu1 %vm285_vm1, %v139_v21  ;;  %v1385_v44 = vadd.f32 %v3972_v47, %v1384_v28  ;;  %v2177_v59 = vadd.f32 %v2176_v3, %v2175_v40  ;;  %v2315_v19 = vadd.f32 %v2314_v24, %v2313_v27 }
 0x1c5   :  { %v2454_v20 = vsel %vm2099_vm2, %v2008_v13, 0.0  ;;  %v2592_v25 = vsel %vm2099_vm2, %v2072_v12, 0.0  ;;  %2897 = vmatmul.msk.f32.gmra.mxu2 %vm285_vm1, %v202_v60  ;;  %2961 = vmatmul.msk.f32.gmra.mxu3 %vm285_vm1, %v266_v8  ;;  %v1881_v12 = vmax.f32 %v1190_v46, 0.0  ;;  %v1945_v60 = vmax.f32 %v1382_v2, 0.0 }
 0x1c6   :  { %v2455_v26 = vadd.f32 %v2454_v20, %v2453_v63  ;;  %v2593_v52 = vadd.f32 %v2592_v25, %v2591_v48  ;;  %v2178_v2 = vsel %vm2099_vm2, %v1880_v30, 0.0  ;;  %v2316_v20 = vsel %vm2099_vm2, %v1944_v39, 0.0 }
 0x1c7   :  { %v1882_v25 = vmax.f32 %v1193_v16, 0.0  ;;  %v2179_v39 = vadd.f32 %v2178_v2, %v2177_v59  ;;  %v2317_v16 = vadd.f32 %v2316_v20, %v2315_v19  ;;  %v268_v2 = vld [vmem:[%s4969_s0 + $0x7c0] sm:$0xff] }
 0x1c8   :  { %v1573_v21 = vpop.f32.mrf.mxu2  ;;  %v1765_v13 = vpop.f32.mrf.mxu3 }
 0x1c9   :  { %v1574_v8 = vadd.f32 %v3972_v47, %v1573_v21  ;;  %v1766_v63 = vadd.f32 %v3972_v47, %v1765_v13  ;;  %v1195_v48 = vpop.f32.mrf.mxu0  ;;  %v1387_v29 = vpop.f32.mrf.mxu1  ;;  %v1946_v21 = vmax.f32 %v1385_v44, 0.0  ;;  %v2180_v13 = vsel %vm2099_vm2, %v1881_v12, 0.0 }
 0x1ca   :  { %v1196_v28 = vadd.f32 %v3972_v47, %v1195_v48  ;;  %v1388_v49 = vadd.f32 %v3972_v47, %v1387_v29  ;;  %v2318_v48 = vsel %vm2099_vm2, %v1945_v60, 0.0  ;;  %v2182_v44 = vsel %vm2099_vm2, %v1882_v25, 0.0 }
 0x1cb   :  { %v2009_v57 = vmax.f32 %v1574_v8, 0.0  ;;  %v2073_v46 = vmax.f32 %v1766_v63, 0.0  ;;  %v2320_v12 = vsel %vm2099_vm2, %v1946_v21, 0.0  ;;  %v2181_v63 = vadd.f32 %v2180_v13, %v2179_v39 }
 0x1cc   :  { %2771 = vmatmul.msk.f32.gmra.mxu0 %vm285_vm1, %v76_v41  ;;  %2835 = vmatmul.msk.f32.gmra.mxu1 %vm285_vm1, %v140_v58  ;;  %v1883_v24 = vmax.f32 %v1196_v28, 0.0  ;;  %v1947_v30 = vmax.f32 %v1388_v49, 0.0  ;;  %v2319_v41 = vadd.f32 %v2318_v48, %v2317_v16 }
 0x1cd   :  { %v2456_v29 = vsel %vm2099_vm2, %v2009_v57, 0.0  ;;  %v2594_v40 = vsel %vm2099_vm2, %v2073_v46, 0.0  ;;  %2898 = vmatmul.msk.f32.gmra.mxu2 %vm285_vm1, %v203_v45  ;;  %2962 = vmatmul.msk.f32.gmra.mxu3 %vm285_vm1, %v267_v11  ;;  %v204_v46 = vld [vmem:[%s4969_s0 + $0x5c0] sm:$0xff]  ;;  %v2183_v20 = vadd.f32 %v2182_v44, %v2181_v63 }
 0x1ce   :  { %v2457_v27 = vadd.f32 %v2456_v29, %v2455_v26  ;;  %v2595_v3 = vadd.f32 %v2594_v40, %v2593_v52  ;;  %v77_v26 = vld [vmem:[%s4969_s0 + $0x1c8] sm:$0xff]  ;;  %v2184_v28 = vsel %vm2099_vm2, %v1883_v24, 0.0  ;;  %v2322_v49 = vsel %vm2099_vm2, %v1947_v30, 0.0 }
 0x1cf   :  { %v141_v52 = vld [vmem:[%s4969_s0 + $0x3c8] sm:$0xff]  ;;  %v2321_v25 = vadd.f32 %v2320_v12, %v2319_v41  ;;  %v2185_v40 = vadd.f32 %v2184_v28, %v2183_v20 }
 0x1d0   :  { %v1576_v8 = vpop.f32.mrf.mxu2  ;;  %v1768_v60 = vpop.f32.mrf.mxu3 }
 0x1d1   :  { %v1577_v58 = vadd.f32 %v3972_v47, %v1576_v8  ;;  %v1769_v45 = vadd.f32 %v3972_v47, %v1768_v60  ;;  %v1198_v57 = vpop.f32.mrf.mxu0  ;;  %v1390_v11 = vpop.f32.mrf.mxu1  ;;  %v2323_v24 = vadd.f32 %v2322_v49, %v2321_v25  ;;  %v205_v49 = vld [vmem:[%s4969_s0 + $0x5c8] sm:$0xff] }
 0x1d2   :  { %v1199_v59 = vadd.f32 %v3972_v47, %v1198_v57  ;;  %v1391_v19 = vadd.f32 %v3972_v47, %v1390_v11 }
 0x1d3   :  { %v2010_v21 = vmax.f32 %v1577_v58, 0.0  ;;  %v2074_v13 = vmax.f32 %v1769_v45, 0.0 }
 0x1d4   :  { %v1884_v48 = vmax.f32 %v1199_v59, 0.0  ;;  %v1948_v29 = vmax.f32 %v1391_v19, 0.0  ;;  %2772 = vmatmul.msk.f32.gmra.mxu0 %vm285_vm1, %v77_v26  ;;  %2836 = vmatmul.msk.f32.gmra.mxu1 %vm285_vm1, %v141_v52  ;;  %v78_v52 = vld [vmem:[%s4969_s0 + $0x1d0] sm:$0xff]  ;;  %v269_v59 = vld [vmem:[%s4969_s0 + $0x7c8] sm:$0xff] }
 0x1d5   :  { %v2458_v30 = vsel %vm2099_vm2, %v2010_v21, 0.0  ;;  %v2596_v39 = vsel %vm2099_vm2, %v2074_v13, 0.0  ;;  %2899 = vmatmul.msk.f32.gmra.mxu2 %vm285_vm1, %v204_v46  ;;  %2963 = vmatmul.msk.f32.gmra.mxu3 %vm285_vm1, %v268_v2 }
 0x1d6   :  { %v2459_v16 = vadd.f32 %v2458_v30, %v2457_v27  ;;  %v2597_v44 = vadd.f32 %v2596_v39, %v2595_v3  ;;  %v2186_v12 = vsel %vm2099_vm2, %v1884_v48, 0.0  ;;  %v2324_v8 = vsel %vm2099_vm2, %v1948_v29, 0.0  ;;  %v142_v27 = vld [vmem:[%s4969_s0 + $0x3d0] sm:$0xff] }
 0x1d7   :  { %v2187_v60 = vadd.f32 %v2186_v12, %v2185_v40  ;;  %v2325_v63 = vadd.f32 %v2324_v8, %v2323_v24  ;;  %v1076_v8 = vadd.f32 %v3972_v47, %v3293_v5  ;;  %v206_v5 = vld [vmem:[%s4969_s0 + $0x5d0] sm:$0xff] }
 0x1d8   :  { %v1579_v41 = vpop.f32.mrf.mxu2  ;;  %v1771_v58 = vpop.f32.mrf.mxu3 }
 0x1d9   :  { %v1580_v45 = vadd.f32 %v3972_v47, %v1579_v41  ;;  %v1772_v57 = vadd.f32 %v3972_v47, %v1771_v58  ;;  %v1201_v11 = vpop.f32.mrf.mxu0  ;;  %v1393_v26 = vpop.f32.mrf.mxu1 }
 0x1da   :  { %v1202_v3 = vadd.f32 %v3972_v47, %v1201_v11  ;;  %v1394_v28 = vadd.f32 %v3972_v47, %v1393_v26  ;;  %v270_v11 = vld [vmem:[%s4969_s0 + $0x7d0] sm:$0xff]  ;;  %v1268_v26 = vadd.f32 %v3972_v47, %v3295_v6 }
 0x1db   :  { %v2011_v19 = vmax.f32 %v1580_v45, 0.0  ;;  %v2075_v46 = vmax.f32 %v1772_v57, 0.0 }
 0x1dc   :  { %v1885_v2 = vmax.f32 %v1202_v3, 0.0  ;;  %v1949_v20 = vmax.f32 %v1394_v28, 0.0  ;;  %2773 = vmatmul.msk.f32.gmra.mxu0 %vm285_vm1, %v78_v52  ;;  %2837 = vmatmul.msk.f32.gmra.mxu1 %vm285_vm1, %v142_v27  ;;  %v1079_v3 = vadd.f32 %v3972_v47, %v3320_v14 }
 0x1dd   :  { %v2460_v25 = vsel %vm2099_vm2, %v2011_v19, 0.0  ;;  %v2598_v21 = vsel %vm2099_vm2, %v2075_v46, 0.0  ;;  %2900 = vmatmul.msk.f32.gmra.mxu2 %vm285_vm1, %v205_v49  ;;  %2964 = vmatmul.msk.f32.gmra.mxu3 %vm285_vm1, %v269_v59  ;;  %v1843_v59 = vmax.f32 %v1076_v8, 0.0  ;;  %v1271_v19 = vadd.f32 %v3972_v47, %v3322_v15 }
 0x1de   :  { %v2461_v13 = vadd.f32 %v2460_v25, %v2459_v16  ;;  %v2599_v48 = vadd.f32 %v2598_v21, %v2597_v44  ;;  %v2188_v29 = vsel %vm2099_vm2, %v1885_v2, 0.0  ;;  %v2326_v40 = vsel %vm2099_vm2, %v1949_v20, 0.0  ;;  %v79_v16 = vld [vmem:[%s4969_s0 + $0x1d8] sm:$0xff] }
 0x1df   :  { %v2189_v24 = vadd.f32 %v2188_v29, %v2187_v60  ;;  %v2327_v30 = vadd.f32 %v2326_v40, %v2325_v63  ;;  %v143_v44 = vld [vmem:[%s4969_s0 + $0x3d8] sm:$0xff]  ;;  %v1907_v21 = vmax.f32 %v1268_v26, 0.0  ;;  %v1082_v29 = vadd.f32 %v3972_v47, %v3340_v22  ;;  %v144_v22 = vld [vmem:[%s4969_s0 + $0x3e0] sm:$0xff] }
 0x1e0   :  { %v1582_v39 = vpop.f32.mrf.mxu2  ;;  %v1774_v12 = vpop.f32.mrf.mxu3 }
 0x1e1   :  { %v1583_v41 = vadd.f32 %v3972_v47, %v1582_v39  ;;  %v1775_v58 = vadd.f32 %v3972_v47, %v1774_v12  ;;  %v1204_v45 = vpop.f32.mrf.mxu0  ;;  %v1396_v57 = vpop.f32.mrf.mxu1  ;;  %v1844_v39 = vmax.f32 %v1079_v3, 0.0 }
 0x1e2   :  { %v1205_v60 = vadd.f32 %v3972_v47, %v1204_v45  ;;  %v1397_v63 = vadd.f32 %v3972_v47, %v1396_v57 }
 0x1e3   :  { %v2012_v52 = vmax.f32 %v1583_v41, 0.0  ;;  %v2076_v27 = vmax.f32 %v1775_v58, 0.0  ;;  %v1908_v41 = vmax.f32 %v1271_v19, 0.0  ;;  %v1274_v58 = vadd.f32 %v3972_v47, %v3342_v23 }
 0x1e4   :  { %v1886_v28 = vmax.f32 %v1205_v60, 0.0  ;;  %v1950_v49 = vmax.f32 %v1397_v63, 0.0  ;;  %2774 = vmatmul.msk.f32.gmra.mxu0 %vm285_vm1, %v79_v16  ;;  %2838 = vmatmul.msk.f32.gmra.mxu1 %vm285_vm1, %v143_v44  ;;  %v80_v16 = vld [vmem:[%s4969_s0 + $0x1e0] sm:$0xff]  ;;  %v207_v44 = vld [vmem:[%s4969_s0 + $0x5d8] sm:$0xff]  ;;  %v2238_v63 = vsel %vm2099_vm2, %v1907_v21, 0.0 }
 0x1e5   :  { %v2462_v46 = vsel %vm2099_vm2, %v2012_v52, 0.0  ;;  %v2600_v2 = vsel %vm2099_vm2, %v2076_v27, 0.0  ;;  %2901 = vmatmul.msk.f32.gmra.mxu2 %vm285_vm1, %v206_v5  ;;  %2965 = vmatmul.msk.f32.gmra.mxu3 %vm285_vm1, %v270_v11  ;;  %v271_v60 = vld [vmem:[%s4969_s0 + $0x7d8] sm:$0xff]  ;;  %v1845_v5 = vmax.f32 %v1082_v29, 0.0  ;;  %v2101_v52 = vsel %vm2099_vm2, %v1844_v39, 0.0 }
 0x1e6   :  { %v2463_v6 = vadd.f32 %v2462_v46, %v2461_v13  ;;  %v2601_v14 = vadd.f32 %v2600_v2, %v2599_v48  ;;  %v2190_v20 = vsel %vm2099_vm2, %v1886_v28, 0.0  ;;  %v2328_v25 = vsel %vm2099_vm2, %v1950_v49, 0.0 }
 0x1e7   :  { %v2191_v40 = vadd.f32 %v2190_v20, %v2189_v24  ;;  %v2329_v15 = vadd.f32 %v2328_v25, %v2327_v30  ;;  %v2100_v24 = vsel %vm2099_vm2, %v1843_v59, 0.0  ;;  %v1085_v27 = vadd.f32 %v3972_v47, %v3369_v37 }
 0x1e8   :  { %v1585_v12 = vpop.f32.mrf.mxu2  ;;  %v1777_v8 = vpop.f32.mrf.mxu3  ;;  %v2239_v49 = vsel %vm2099_vm2, %v1908_v41, 0.0  ;;  %v1909_v59 = vmax.f32 %v1274_v58, 0.0  ;;  %v2103_v21 = vsel %vm2099_vm2, %v1845_v5, 0.0  ;;  %v1277_v29 = vadd.f32 %v3972_v47, %v3371_v38  ;;  %v81_v38 = vld [vmem:[%s4969_s0 + $0x1e8] sm:$0xff] }
 0x1e9   :  { %v1586_v13 = vadd.f32 %v3972_v47, %v1585_v12  ;;  %v1778_v48 = vadd.f32 %v3972_v47, %v1777_v8  ;;  %v1207_v45 = vpop.f32.mrf.mxu0  ;;  %v1399_v57 = vpop.f32.mrf.mxu1  ;;  %v2102_v8 = vadd.f32 %v2101_v52, %v2100_v24  ;;  %v1846_v41 = vmax.f32 %v1085_v27, 0.0 }
 0x1ea   :  { %v1208_v30 = vadd.f32 %v3972_v47, %v1207_v45  ;;  %v1400_v23 = vadd.f32 %v3972_v47, %v1399_v57 }
 0x1eb   :  { %v2013_v11 = vmax.f32 %v1586_v13, 0.0  ;;  %v2077_v26 = vmax.f32 %v1778_v48, 0.0  ;;  %v2240_v48 = vadd.f32 %v2239_v49, %v2238_v63 }
 0x1ec   :  { %v1887_v3 = vmax.f32 %v1208_v30, 0.0  ;;  %v1951_v28 = vmax.f32 %v1400_v23, 0.0  ;;  %2775 = vmatmul.msk.f32.gmra.mxu0 %vm285_vm1, %v80_v16  ;;  %2839 = vmatmul.msk.f32.gmra.mxu1 %vm285_vm1, %v144_v22  ;;  %v2241_v22 = vsel %vm2099_vm2, %v1909_v59, 0.0  ;;  %v208_v30 = vld [vmem:[%s4969_s0 + $0x5e0] sm:$0xff] }
 0x1ed   :  { %v2464_v19 = vsel %vm2099_vm2, %v2013_v11, 0.0  ;;  %v2602_v46 = vsel %vm2099_vm2, %v2077_v26, 0.0  ;;  %2902 = vmatmul.msk.f32.gmra.mxu2 %vm285_vm1, %v207_v44  ;;  %2966 = vmatmul.msk.f32.gmra.mxu3 %vm285_vm1, %v271_v60  ;;  %v272_v23 = vld [vmem:[%s4969_s0 + $0x7e0] sm:$0xff]  ;;  %v1910_v44 = vmax.f32 %v1277_v29, 0.0  ;;  %v1280_v60 = vadd.f32 %v3972_v47, %v3397_v56 }
 0x1ee   :  { %v2465_v2 = vadd.f32 %v2464_v19, %v2463_v6  ;;  %v2603_v20 = vadd.f32 %v2602_v46, %v2601_v14  ;;  %v2192_v37 = vsel %vm2099_vm2, %v1887_v3, 0.0  ;;  %v2330_v25 = vsel %vm2099_vm2, %v1951_v28, 0.0 }
 0x1ef   :  { %v2193_v39 = vadd.f32 %v2192_v37, %v2191_v40  ;;  %v2331_v12 = vadd.f32 %v2330_v25, %v2329_v15  ;;  %v1088_v6 = vadd.f32 %v3972_v47, %v3395_v55  ;;  %v145_v40 = vld [vmem:[%s4969_s0 + $0x3e8] sm:$0xff]  ;;  %v2104_v15 = vadd.f32 %v2103_v21, %v2102_v8 }
 0x1f0   :  { %v1588_v58 = vpop.f32.mrf.mxu2  ;;  %v1780_v13 = vpop.f32.mrf.mxu3  ;;  %v2105_v11 = vsel %vm2099_vm2, %v1846_v41, 0.0  ;;  %v1091_v26 = vadd.f32 %v3972_v47, %v3419_v9  ;;  %v1283_v28 = vadd.f32 %v3972_v47, %v3421_v10  ;;  %v2243_v37 = vsel %vm2099_vm2, %v1910_v44, 0.0 }
 0x1f1   :  { %v1589_v14 = vadd.f32 %v3972_v47, %v1588_v58  ;;  %v1781_v45 = vadd.f32 %v3972_v47, %v1780_v13  ;;  %v1210_v57 = vpop.f32.mrf.mxu0  ;;  %v1402_v16 = vpop.f32.mrf.mxu1  ;;  %v1847_v3 = vmax.f32 %v1088_v6, 0.0  ;;  %v1911_v25 = vmax.f32 %v1280_v60, 0.0 }
 0x1f2   :  { %v1211_v24 = vadd.f32 %v3972_v47, %v1210_v57  ;;  %v1403_v55 = vadd.f32 %v3972_v47, %v1402_v16  ;;  %v2242_v10 = vadd.f32 %v2241_v22, %v2240_v48  ;;  %v2106_v8 = vadd.f32 %v2105_v11, %v2104_v15  ;;  %v273_v15 = vld [vmem:[%s4969_s0 + $0x7e8] sm:$0xff] }
 0x1f3   :  { %v2014_v63 = vmax.f32 %v1589_v14, 0.0  ;;  %v2078_v5 = vmax.f32 %v1781_v45, 0.0  ;;  %v1848_v41 = vmax.f32 %v1091_v26, 0.0  ;;  %v1912_v6 = vmax.f32 %v1283_v28, 0.0 }
 0x1f4   :  { %v1888_v52 = vmax.f32 %v1211_v24, 0.0  ;;  %v1952_v27 = vmax.f32 %v1403_v55, 0.0  ;;  %2776 = vmatmul.msk.f32.gmra.mxu0 %vm285_vm1, %v81_v38  ;;  %2840 = vmatmul.msk.f32.gmra.mxu1 %vm285_vm1, %v145_v40  ;;  %v1094_v14 = vadd.f32 %v3972_v47, %v3443_v32  ;;  %v2244_v48 = vadd.f32 %v2243_v37, %v2242_v10  ;;  %v4492_v32 = vld [vmem:[%s4970_s2] ss:$0 sm:$0xff]  ;;  %v209_v40 = vld [vmem:[%s4969_s0 + $0x5e8] sm:$0xff] }
 0x1f5   :  { %v2466_v49 = vsel %vm2099_vm2, %v2014_v63, 0.0  ;;  %v2604_v56 = vsel %vm2099_vm2, %v2078_v5, 0.0  ;;  %2903 = vmatmul.msk.f32.gmra.mxu2 %vm285_vm1, %v208_v30  ;;  %2967 = vmatmul.msk.f32.gmra.mxu3 %vm285_vm1, %v272_v23  ;;  %v2107_v16 = vsel %vm2099_vm2, %v1847_v3, 0.0  ;;  %v2245_v22 = vsel %vm2099_vm2, %v1911_v25, 0.0 }
 0x1f6   :  { %v2467_v59 = vadd.f32 %v2466_v49, %v2465_v2  ;;  %v2605_v9 = vadd.f32 %v2604_v56, %v2603_v20  ;;  %v2194_v19 = vsel %vm2099_vm2, %v1888_v52, 0.0  ;;  %v2332_v46 = vsel %vm2099_vm2, %v1952_v27, 0.0 }
 0x1f7   :  { %v2195_v21 = vadd.f32 %v2194_v19, %v2193_v39  ;;  %v2333_v29 = vadd.f32 %v2332_v46, %v2331_v12  ;;  %v82_v39 = vld [vmem:[%s4969_s0 + $0x1f0] sm:$0xff]  ;;  %v1286_v24 = vadd.f32 %v4492_v32, %v3445_v33  ;;  %v2109_v23 = vsel %vm2099_vm2, %v1848_v41, 0.0 }
 0x1f8   :  { %v1591_v58 = vpop.f32.mrf.mxu2  ;;  %v1783_v13 = vpop.f32.mrf.mxu3  ;;  %v146_v12 = vld [vmem:[%s4969_s0 + $0x3f0] sm:$0xff]  ;;  %v1097_v44 = vadd.f32 %v4492_v32, %v3467_v50  ;;  %v2247_v5 = vsel %vm2099_vm2, %v1912_v6, 0.0  ;;  %v1849_v11 = vmax.f32 %v1094_v14, 0.0  ;;  %v1289_v49 = vadd.f32 %v4492_v32, %v3469_v51  ;;  %v83_v51 = vld [vmem:[%s4969_s0 + $0x1f8] sm:$0xff] }
 0x1f9   :  { %v1592_v2 = vadd.f32 %v3972_v47, %v1591_v58  ;;  %v1784_v20 = vadd.f32 %v3972_v47, %v1783_v13  ;;  %v1213_v45 = vpop.f32.mrf.mxu0  ;;  %v1405_v57 = vpop.f32.mrf.mxu1  ;;  %v1913_v28 = vmax.f32 %v1286_v24, 0.0  ;;  %v2108_v46 = vadd.f32 %v2107_v16, %v2106_v8 }
 0x1fa   :  { %v1214_v47 = vadd.f32 %v4492_v32, %v1213_v45  ;;  %v1406_v38 = vadd.f32 %v4492_v32, %v1405_v57  ;;  %v2246_v37 = vadd.f32 %v2245_v22, %v2244_v48  ;;  %v1850_v25 = vmax.f32 %v1097_v44, 0.0 }
 0x1fb   :  { %v2015_v55 = vmax.f32 %v1592_v2, 0.0  ;;  %v2079_v30 = vmax.f32 %v1784_v20, 0.0  ;;  %v2111_v58 = vsel %vm2099_vm2, %v1849_v11, 0.0  ;;  %v274_v20 = vld [vmem:[%s4969_s0 + $0x7f0] sm:$0xff]  ;;  %v2249_v45 = vsel %vm2099_vm2, %v1913_v28, 0.0 }
 0x1fc   :  { %v1889_v60 = vmax.f32 %v1214_v47, 0.0  ;;  %v1953_v63 = vmax.f32 %v1406_v38, 0.0  ;;  %2777 = vmatmul.msk.f32.gmra.mxu0 %vm285_vm1, %v82_v39  ;;  %2841 = vmatmul.msk.f32.gmra.mxu1 %vm285_vm1, %v146_v12  ;;  %v1914_v57 = vmax.f32 %v1289_v49, 0.0  ;;  %v2113_v16 = vsel %vm2099_vm2, %v1850_v25, 0.0 }
 0x1fd   :  { %v2468_v26 = vsel %vm2099_vm2, %v2015_v55, 0.0  ;;  %v2606_v33 = vsel %vm2099_vm2, %v2079_v30, 0.0  ;;  %2904 = vmatmul.msk.f32.gmra.mxu2 %vm285_vm1, %v209_v40  ;;  %2968 = vmatmul.msk.f32.gmra.mxu3 %vm285_vm1, %v273_v15  ;;  %v1292_v15 = vadd.f32 %v4492_v32, %v3493_v7 }
 0x1fe   :  { %v2469_v52 = vadd.f32 %v2468_v26, %v2467_v59  ;;  %v2607_v27 = vadd.f32 %v2606_v33, %v2605_v9  ;;  %v2196_v50 = vsel %vm2099_vm2, %v1889_v60, 0.0  ;;  %v2334_v3 = vsel %vm2099_vm2, %v1953_v63, 0.0 }
 0x1ff   :  { %v2197_v56 = vadd.f32 %v2196_v50, %v2195_v21  ;;  %v2335_v19 = vadd.f32 %v2334_v3, %v2333_v29  ;;  %v1100_v59 = vadd.f32 %v4492_v32, %v3491_v4  ;;  %v2110_v21 = vadd.f32 %v2109_v23, %v2108_v46  ;;  %v210_v4 = vld [vmem:[%s4969_s0 + $0x5f0] sm:$0xff] }
 0x200   :  { %v1594_v10 = vpop.f32.mrf.mxu2  ;;  %v1786_v41 = vpop.f32.mrf.mxu3  ;;  %v2248_v29 = vadd.f32 %v2247_v5, %v2246_v37  ;;  %v2251_v60 = vsel %vm2099_vm2, %v1914_v57, 0.0  ;;  %v1103_v63 = vadd.f32 %v4492_v32, %v3515_v31  ;;  %v1295_v26 = vadd.f32 %v4492_v32, %v3517_v34  ;;  %v275_v34 = vld [vmem:[%s4969_s0 + $0x7f8] sm:$0xff] }
 0x201   :  { %v1595_v9 = vadd.f32 %v4492_v32, %v1594_v10  ;;  %v1787_v13 = vadd.f32 %v4492_v32, %v1786_v41  ;;  %v1216_v6 = vpop.f32.mrf.mxu0  ;;  %v1408_v14 = vpop.f32.mrf.mxu1  ;;  %v2112_v48 = vadd.f32 %v2111_v58, %v2110_v21  ;;  %v1851_v40 = vmax.f32 %v1100_v59, 0.0 }
 0x202   :  { %v1217_v8 = vadd.f32 %v4492_v32, %v1216_v6  ;;  %v1409_v2 = vadd.f32 %v4492_v32, %v1408_v14  ;;  %v2250_v11 = vadd.f32 %v2249_v45, %v2248_v29  ;;  %v1106_v10 = vadd.f32 %v4492_v32, %v3539_v53 }
 0x203   :  { %v2016_v39 = vmax.f32 %v1595_v9, 0.0  ;;  %v2080_v12 = vmax.f32 %v1787_v13, 0.0  ;;  %v2114_v3 = vadd.f32 %v2113_v16, %v2112_v48  ;;  %v2115_v25 = vsel %vm2099_vm2, %v1851_v40, 0.0 }
 0x204   :  { %v1890_v47 = vmax.f32 %v1217_v8, 0.0  ;;  %v1954_v38 = vmax.f32 %v1409_v2, 0.0  ;;  %2778 = vmatmul.msk.f32.gmra.mxu0 %vm285_vm1, %v83_v51  ;;  %v2252_v37 = vadd.f32 %v2251_v60, %v2250_v11  ;;  %v1916_v59 = vmax.f32 %v1295_v26, 0.0 }
 0x205   :  { %v2470_v22 = vsel %vm2099_vm2, %v2016_v39, 0.0  ;;  %v2608_v24 = vsel %vm2099_vm2, %v2080_v12, 0.0  ;;  %2905 = vmatmul.msk.f32.gmra.mxu2 %vm285_vm1, %v210_v4  ;;  %2969 = vmatmul.msk.f32.gmra.mxu3 %vm285_vm1, %v274_v20  ;;  %v1298_v9 = vadd.f32 %v4492_v32, %v3541_v54  ;;  %v1109_v51 = vadd.f32 %v4492_v32, %v3563_v17 }
 0x206   :  { %v2471_v55 = vadd.f32 %v2470_v22, %v2469_v52  ;;  %v2609_v30 = vadd.f32 %v2608_v24, %v2607_v27  ;;  %v2198_v23 = vsel %vm2099_vm2, %v1890_v47, 0.0  ;;  %v2336_v44 = vsel %vm2099_vm2, %v1954_v38, 0.0 }
 0x207   :  { %v2199_v7 = vadd.f32 %v2198_v23, %v2197_v56  ;;  %v2337_v5 = vadd.f32 %v2336_v44, %v2335_v19  ;;  %v1915_v52 = vmax.f32 %v1292_v15, 0.0  ;;  %v1852_v19 = vmax.f32 %v1103_v63, 0.0 }
 0x208   :  { %v1597_v33 = vpop.f32.mrf.mxu2  ;;  %v1789_v50 = vpop.f32.mrf.mxu3  ;;  %v1853_v20 = vmax.f32 %v1106_v10, 0.0  ;;  %v2116_v39 = vadd.f32 %v2115_v25, %v2114_v3  ;;  %v2255_v17 = vsel %vm2099_vm2, %v1916_v59, 0.0  ;;  %v1917_v12 = vmax.f32 %v1298_v9, 0.0 }
 0x209   :  { %v1598_v27 = vadd.f32 %v4492_v32, %v1597_v33  ;;  %v1790_v28 = vadd.f32 %v4492_v32, %v1789_v50  ;;  %v1219_v49 = vpop.f32.mrf.mxu0  ;;  %v1411_v46 = vpop.f32.mrf.mxu1  ;;  %v2253_v14 = vsel %vm2099_vm2, %v1915_v52, 0.0  ;;  %v2117_v54 = vsel %vm2099_vm2, %v1852_v19, 0.0 }
 0x20a   :  { %v1220_v31 = vadd.f32 %v4492_v32, %v1219_v49  ;;  %v1412_v56 = vadd.f32 %v4492_v32, %v1411_v46  ;;  %v1301_v48 = vadd.f32 %v4492_v32, %v3565_v18  ;;  %v2254_v38 = vadd.f32 %v2253_v14, %v2252_v37 }
 0x20b   :  { %v2017_v41 = vmax.f32 %v1598_v27, 0.0  ;;  %v2081_v58 = vmax.f32 %v1790_v28, 0.0  ;;  %v1854_v40 = vmax.f32 %v1109_v51, 0.0  ;;  %v2119_v63 = vsel %vm2099_vm2, %v1853_v20, 0.0 }
 0x20c   :  { %v1891_v13 = vmax.f32 %v1220_v31, 0.0  ;;  %v1955_v6 = vmax.f32 %v1412_v56, 0.0  ;;  %v2256_v60 = vadd.f32 %v2255_v17, %v2254_v38  ;;  %v1918_v11 = vmax.f32 %v1301_v48, 0.0 }
 0x20d   :  { %v2472_v21 = vsel %vm2099_vm2, %v2017_v41, 0.0  ;;  %v2610_v29 = vsel %vm2099_vm2, %v2081_v58, 0.0  ;;  %2970 = vmatmul.msk.f32.gmra.mxu3 %vm285_vm1, %v275_v34  ;;  %v2121_v50 = vsel %vm2099_vm2, %v1854_v40, 0.0  ;;  %v1112_v3 = vadd.f32 %v4492_v32, %v3587_v42 }
 0x20e   :  { %v2473_v53 = vadd.f32 %v2472_v21, %v2471_v55  ;;  %v2611_v8 = vadd.f32 %v2610_v29, %v2609_v30  ;;  %v2200_v2 = vsel %vm2099_vm2, %v1891_v13, 0.0  ;;  %v2338_v4 = vsel %vm2099_vm2, %v1955_v6, 0.0 }
 0x20f   :  { %v2201_v45 = vadd.f32 %v2200_v2, %v2199_v7  ;;  %v2339_v57 = vadd.f32 %v2338_v4, %v2337_v5  ;;  %v2118_v30 = vadd.f32 %v2117_v54, %v2116_v39  ;;  %v2257_v5 = vsel %vm2099_vm2, %v1917_v12, 0.0 }
 0x210   :  { %v1600_v16 = vpop.f32.mrf.mxu2  ;;  %v1792_v47 = vpop.f32.mrf.mxu3  ;;  %v1304_v25 = vadd.f32 %v4492_v32, %v3589_v43  ;;  %v1115_v31 = vadd.f32 %v4492_v32, %v3611_v0  ;;  %v2258_v42 = vadd.f32 %v2257_v5, %v2256_v60  ;;  %v1855_v58 = vmax.f32 %v1112_v3, 0.0 }
 0x211   :  { %v1601_v15 = vadd.f32 %v4492_v32, %v1600_v16  ;;  %v1793_v22 = vadd.f32 %v4492_v32, %v1792_v47  ;;  %v1222_v24 = vpop.f32.mrf.mxu0  ;;  %v1414_v55 = vpop.f32.mrf.mxu1  ;;  %v2120_v19 = vadd.f32 %v2119_v63, %v2118_v30  ;;  %v1307_v59 = vadd.f32 %v4492_v32, %v3613_v1 }
 0x212   :  { %v1223_v23 = vadd.f32 %v4492_v32, %v1222_v24  ;;  %v1415_v44 = vadd.f32 %v4492_v32, %v1414_v55  ;;  %v2259_v51 = vsel %vm2099_vm2, %v1918_v11, 0.0  ;;  %v1919_v29 = vmax.f32 %v1304_v25, 0.0 }
 0x213   :  { %v2018_v7 = vmax.f32 %v1601_v15, 0.0  ;;  %v2082_v18 = vmax.f32 %v1793_v22, 0.0  ;;  %v2122_v43 = vadd.f32 %v2121_v50, %v2120_v19  ;;  %v1118_v1 = vadd.f32 %v4492_v32, %v3635_v35 }
 0x214   :  { %v1892_v26 = vmax.f32 %v1223_v23, 0.0  ;;  %v1956_v33 = vmax.f32 %v1415_v44, 0.0  ;;  %v1310_v4 = vadd.f32 %v4492_v32, %v3637_v36  ;;  %v2260_v38 = vadd.f32 %v2259_v51, %v2258_v42 }
 0x215   :  { %v2474_v52 = vsel %vm2099_vm2, %v2018_v7, 0.0  ;;  %v2612_v27 = vsel %vm2099_vm2, %v2082_v18, 0.0  ;;  %v2261_v35 = vsel %vm2099_vm2, %v1919_v29, 0.0  ;;  %v1857_v24 = vmax.f32 %v1118_v1, 0.0 }
 0x216   :  { %v2475_v28 = vadd.f32 %v2474_v52, %v2473_v53  ;;  %v2613_v49 = vadd.f32 %v2612_v27, %v2611_v8  ;;  %v2202_v46 = vsel %vm2099_vm2, %v1892_v26, 0.0  ;;  %v2340_v37 = vsel %vm2099_vm2, %v1956_v33, 0.0  ;;  %v5012_v52 = vld [vmem:[#allocation4_spill] sm:$0xff] }
 0x217   :  { %v2203_v56 = vadd.f32 %v2202_v46, %v2201_v45  ;;  %v2341_v34 = vadd.f32 %v2340_v37, %v2339_v57  ;;  %v1856_v53 = vmax.f32 %v1115_v31, 0.0  ;;  %v2123_v45 = vsel %vm2099_vm2, %v1855_v58, 0.0 }
 0x218   :  { %v1603_v10 = vpop.f32.mrf.mxu2  ;;  %v1795_v41 = vpop.f32.mrf.mxu3  ;;  %v1920_v57 = vmax.f32 %v1307_v59, 0.0  ;;  %v2124_v15 = vadd.f32 %v2123_v45, %v2122_v43  ;;  %v1921_v55 = vmax.f32 %v1310_v4, 0.0  ;;  %v1121_v44 = vadd.f32 %v4492_v32, %v3659_v61  ;;  %v5013_v59 = vld [vmem:[#allocation5_spill] sm:$0xff]  ;;  %v5014_v43 = vld [vmem:[#allocation6_spill] sm:$0xff] }
 0x219   :  { %v1604_v9 = vadd.f32 %v4492_v32, %v1603_v10  ;;  %v1796_v13 = vadd.f32 %v4492_v32, %v1795_v41  ;;  %v1225_v6 = vpop.f32.mrf.mxu0  ;;  %v1417_v14 = vpop.f32.mrf.mxu1  ;;  %v2125_v22 = vsel %vm2099_vm2, %v1856_v53, 0.0  ;;  %v1313_v60 = vadd.f32 %v4492_v32, %v3661_v62  ;;  %v5015_v53 = vld [vmem:[#allocation7_spill] sm:$0xff] }
 0x21a   :  { %v1226_v0 = vadd.f32 %v4492_v32, %v1225_v6  ;;  %v1418_v21 = vadd.f32 %v4492_v32, %v1417_v14  ;;  %v2262_v11 = vadd.f32 %v2261_v35, %v2260_v38  ;;  %v2263_v26 = vsel %vm2099_vm2, %v1920_v57, 0.0  ;;  %v5016_v38 = vld [vmem:[#allocation8_spill] sm:$0xff] }
 0x21b   :  { %v2019_v8 = vmax.f32 %v1604_v9, 0.0  ;;  %v2083_v2 = vmax.f32 %v1796_v13, 0.0  ;;  %v2126_v3 = vadd.f32 %v2125_v22, %v2124_v15  ;;  %v1124_v61 = vadd.f32 %v4492_v32, %v5012_v52  ;;  %v5020_v52 = vld [vmem:[#allocation12_spill] sm:$0xff] }
 0x21c   :  { %v1893_v54 = vmax.f32 %v1226_v0, 0.0  ;;  %v1957_v20 = vmax.f32 %v1418_v21, 0.0  ;;  %v2127_v62 = vsel %vm2099_vm2, %v1857_v24, 0.0  ;;  %v1858_v25 = vmax.f32 %v1121_v44, 0.0  ;;  %v5018_v24 = vld [vmem:[#allocation10_spill] sm:$0xff]  ;;  %v5019_v44 = vld [vmem:[#allocation11_spill] sm:$0xff] }
 0x21d   :  { %v2476_v39 = vsel %vm2099_vm2, %v2019_v8, 0.0  ;;  %v2614_v17 = vsel %vm2099_vm2, %v2083_v2, 0.0  ;;  %v1922_v31 = vmax.f32 %v1313_v60, 0.0  ;;  %v1859_v58 = vmax.f32 %v1124_v61, 0.0 }
 0x21e   :  { %v2477_v12 = vadd.f32 %v2476_v39, %v2475_v28  ;;  %v2615_v48 = vadd.f32 %v2614_v17, %v2613_v49  ;;  %v2204_v16 = vsel %vm2099_vm2, %v1893_v54, 0.0  ;;  %v2342_v47 = vsel %vm2099_vm2, %v1957_v20, 0.0 }
 0x21f   :  { %v2205_v40 = vadd.f32 %v2204_v16, %v2203_v56  ;;  %v2343_v36 = vadd.f32 %v2342_v47, %v2341_v34  ;;  %v2265_v49 = vsel %vm2099_vm2, %v1921_v55, 0.0  ;;  %v1316_v9 = vadd.f32 %v4492_v32, %v5013_v59 }
 0x220   :  { %v1606_v30 = vpop.f32.mrf.mxu2  ;;  %v1798_v23 = vpop.f32.mrf.mxu3  ;;  %v2264_v14 = vadd.f32 %v2263_v26, %v2262_v11  ;;  %v1127_v51 = vadd.f32 %v4492_v32, %v5014_v43  ;;  %v2128_v29 = vadd.f32 %v2127_v62, %v2126_v3  ;;  %v1319_v8 = vadd.f32 %v4492_v32, %v5015_v53  ;;  %v5024_v53 = vld [vmem:[#allocation16_spill] sm:$0xff] }
 0x221   :  { %v1607_v63 = vadd.f32 %v4492_v32, %v1606_v30  ;;  %v1799_v7 = vadd.f32 %v4492_v32, %v1798_v23  ;;  %v1228_v18 = vpop.f32.mrf.mxu0  ;;  %v1420_v5 = vpop.f32.mrf.mxu1  ;;  %v2129_v45 = vsel %vm2099_vm2, %v1858_v25, 0.0  ;;  %v2267_v57 = vsel %vm2099_vm2, %v1922_v31, 0.0 }
 0x222   :  { %v1229_v33 = vadd.f32 %v4492_v32, %v1228_v18  ;;  %v1421_v50 = vadd.f32 %v4492_v32, %v1420_v5  ;;  %v2266_v20 = vadd.f32 %v2265_v49, %v2264_v14  ;;  %v2131_v17 = vsel %vm2099_vm2, %v1859_v58, 0.0  ;;  %v5022_v58 = vld [vmem:[#allocation14_spill] sm:$0xff] }
 0x223   :  { %v2020_v27 = vmax.f32 %v1607_v63, 0.0  ;;  %v2084_v28 = vmax.f32 %v1799_v7, 0.0  ;;  %v1860_v47 = vmax.f32 %v1127_v51, 0.0  ;;  %v1130_v35 = vadd.f32 %v4492_v32, %v5016_v38  ;;  %v5025_v38 = vld [vmem:[#allocation17_spill] sm:$0xff] }
 0x224   :  { %v1894_v46 = vmax.f32 %v1229_v33, 0.0  ;;  %v1958_v37 = vmax.f32 %v1421_v50, 0.0  ;;  %v1924_v22 = vmax.f32 %v1319_v8, 0.0  ;;  %v1133_v55 = vadd.f32 %v4492_v32, %v5018_v24 }
 0x225   :  { %v2478_v56 = vsel %vm2099_vm2, %v2020_v27, 0.0  ;;  %v2616_v34 = vsel %vm2099_vm2, %v2084_v28, 0.0  ;;  %v1325_v60 = vadd.f32 %v4492_v32, %v5019_v44  ;;  %v2130_v5 = vadd.f32 %v2129_v45, %v2128_v29 }
 0x226   :  { %v2479_v19 = vadd.f32 %v2478_v56, %v2477_v12  ;;  %v2617_v42 = vadd.f32 %v2616_v34, %v2615_v48  ;;  %v2206_v10 = vsel %vm2099_vm2, %v1894_v46, 0.0  ;;  %v2344_v41 = vsel %vm2099_vm2, %v1958_v37, 0.0 }
 0x227   :  { %v2207_v13 = vadd.f32 %v2206_v10, %v2205_v40  ;;  %v4629_v6 = vadd.f32 %v2344_v41, %v2343_v36  ;;  %v1923_v12 = vmax.f32 %v1316_v9, 0.0  ;;  %v5017_v40 = vld [vmem:[#allocation9_spill] sm:$0xff]  ;;  %v2268_v33 = vadd.f32 %v2267_v57, %v2266_v20 }
 0x228   :  { %v1609_v0 = vpop.f32.mrf.mxu2  ;;  %v1801_v21 = vpop.f32.mrf.mxu3  ;;  %v1322_v36 = vadd.f32 %v4492_v32, %v5017_v40  ;;  %v1861_v50 = vmax.f32 %v1130_v35, 0.0  ;;  %v1136_v61 = vadd.f32 %v4492_v32, %v5020_v52  ;;  %v2132_v62 = vadd.f32 %v2131_v17, %v2130_v5  ;;  %v5021_v10 = vld [vmem:[#allocation13_spill] sm:$0xff]  ;;  %v5026_v40 = vld [vmem:[#allocation18_spill] sm:$0xff]  ;;  %v5028_v5 = vld [vmem:[#allocation20_spill] sm:$0xff] }
 0x229   :  { %v1610_v2 = vadd.f32 %v4492_v32, %v1609_v0  ;;  %v1802_v1 = vadd.f32 %v4492_v32, %v1801_v21  ;;  %v1231_v4 = vpop.f32.mrf.mxu0  ;;  %v4637_v54 = vpop.f32.mrf.mxu1  ;;  %v2269_v11 = vsel %vm2099_vm2, %v1923_v12, 0.0  ;;  %v2133_v49 = vsel %vm2099_vm2, %v1860_v47, 0.0  ;;  %v5023_v21 = vld [vmem:[#allocation15_spill] sm:$0xff] }
 0x22a   :  { %v1232_v39 = vadd.f32 %v4492_v32, %v1231_v4  ;;  %v1925_v3 = vmax.f32 %v1322_v36, 0.0  ;;  %v2270_v56 = vadd.f32 %v2269_v11, %v2268_v33  ;;  %v2271_v34 = vsel %vm2099_vm2, %v1924_v22, 0.0 }
 0x22b   :  { %v2021_v48 = vmax.f32 %v1610_v2, 0.0  ;;  %v2085_v16 = vmax.f32 %v1802_v1, 0.0  ;;  %v1328_v41 = vadd.f32 %v4492_v32, %v5021_v10  ;;  %v1139_v59 = vadd.f32 %v4492_v32, %v5022_v58  ;;  %v5032_v58 = vld [vmem:[#allocation24_spill] sm:$0xff] }
 0x22c   :  { %v1895_v15 = vmax.f32 %v1232_v39, 0.0  ;;  %v2134_v14 = vadd.f32 %v2133_v49, %v2132_v62  ;;  %v2135_v43 = vsel %vm2099_vm2, %v1861_v50, 0.0  ;;  %v2273_v51 = vsel %vm2099_vm2, %v1925_v3, 0.0  ;;  %v5030_v49 = vld [vmem:[#allocation22_spill] sm:$0xff] }
 0x22d   :  { %v2480_v30 = vsel %vm2099_vm2, %v2021_v48, 0.0  ;;  %v2618_v23 = vsel %vm2099_vm2, %v2085_v16, 0.0  ;;  %v1863_v0 = vmax.f32 %v1136_v61, 0.0  ;;  %v1331_v29 = vadd.f32 %v4492_v32, %v5023_v21 }
 0x22e   :  { %v2481_v63 = vadd.f32 %v2480_v30, %v2479_v19  ;;  %v2619_v7 = vadd.f32 %v2618_v23, %v2617_v42  ;;  %v2208_v18 = vsel %vm2099_vm2, %v1895_v15, 0.0  ;;  %v1862_v19 = vmax.f32 %v1133_v55, 0.0 }
 0x22f   :  { %v4655_v26 = vadd.f32 %v2208_v18, %v2207_v13  ;;  %v1926_v42 = vmax.f32 %v1325_v60, 0.0  ;;  %v1142_v8 = vadd.f32 %v4492_v32, %v5024_v53  ;;  %v2272_v4 = vadd.f32 %v2271_v34, %v2270_v56  ;;  %v5031_v34 = vld [vmem:[#allocation23_spill] sm:$0xff] }
 0x230   :  { %v1612_v27 = vpop.f32.mrf.mxu2  ;;  %v1804_v28 = vpop.f32.mrf.mxu3  ;;  %v2137_v20 = vsel %vm2099_vm2, %v1862_v19, 0.0  ;;  %v2136_v39 = vadd.f32 %v2135_v43, %v2134_v14  ;;  %v1927_v12 = vmax.f32 %v1328_v41, 0.0  ;;  %v1864_v48 = vmax.f32 %v1139_v59, 0.0  ;;  %v5033_v43 = vld [vmem:[#allocation25_spill] sm:$0xff] }
 0x231   :  { %v1613_v46 = vadd.f32 %v4492_v32, %v1612_v27  ;;  %v1805_v37 = vadd.f32 %v4492_v32, %v1804_v28  ;;  %v4662_v25 = vpop.f32.mrf.mxu0  ;;  %v4664_v31 = vpop.f32.mrf.mxu1  ;;  %v2275_v17 = vsel %vm2099_vm2, %v1926_v42, 0.0  ;;  %v2274_v16 = vadd.f32 %v2273_v51, %v2272_v4  ;;  %v5029_v28 = vld [vmem:[#allocation21_spill] sm:$0xff] }
 0x232   :  { %v2139_v47 = vsel %vm2099_vm2, %v1863_v0, 0.0  ;;  %v1334_v35 = vadd.f32 %v4492_v32, %v5025_v38  ;;  %v1145_v36 = vadd.f32 %v4492_v32, %v5026_v40  ;;  %v2138_v24 = vadd.f32 %v2137_v20, %v2136_v39  ;;  %v5034_v0 = vld [vmem:[#allocation26_spill] sm:$0xff]  ;;  %v5036_v40 = vld [vmem:[#allocation28_spill] sm:$0xff] }
 0x233   :  { %v2022_v9 = vmax.f32 %v1613_v46, 0.0  ;;  %v2086_v13 = vmax.f32 %v1805_v37, 0.0  ;;  %v1928_v55 = vmax.f32 %v1331_v29, 0.0  ;;  %v1865_v30 = vmax.f32 %v1142_v8, 0.0 }
 0x234   :  { %v1148_v11 = vadd.f32 %v4492_v32, %v5028_v5  ;;  %v2140_v33 = vadd.f32 %v2139_v47, %v2138_v24  ;;  %v2277_v50 = vsel %vm2099_vm2, %v1927_v12, 0.0  ;;  %v2141_v3 = vsel %vm2099_vm2, %v1864_v48, 0.0  ;;  %v5038_v5 = vld [vmem:[#allocation30_spill] sm:$0xff] }
 0x235   :  { %v2482_v2 = vsel %vm2099_vm2, %v2022_v9, 0.0  ;;  %v2620_v1 = vsel %vm2099_vm2, %v2086_v13, 0.0  ;;  %v1929_v61 = vmax.f32 %v1334_v35, 0.0  ;;  %v1866_v27 = vmax.f32 %v1145_v36, 0.0 }
 0x236   :  { %v4680_v45 = vadd.f32 %v2482_v2, %v2481_v63  ;;  %v2621_v57 = vadd.f32 %v2620_v1, %v2619_v7  ;;  %v2276_v63 = vadd.f32 %v2275_v17, %v2274_v16  ;;  %v5027_v7 = vld [vmem:[#allocation19_spill] sm:$0xff]  ;;  %v1340_v62 = vadd.f32 %v4492_v32, %v5029_v28 }
 0x237   :  { %v1337_v18 = vadd.f32 %v4492_v32, %v5027_v7  ;;  %v1151_v46 = vadd.f32 %v4492_v32, %v5030_v49  ;;  %v2279_v37 = vsel %vm2099_vm2, %v1928_v55, 0.0  ;;  %v2143_v56 = vsel %vm2099_vm2, %v1865_v30, 0.0  ;;  %v5035_v17 = vld [vmem:[#allocation27_spill] sm:$0xff]  ;;  %v5037_v7 = vld [vmem:[#allocation29_spill] sm:$0xff]  ;;  %v5040_v49 = vld [vmem:[#allocation32_spill] sm:$0xff] }
 0x238   :  { %v4688_v15 = vpop.f32.mrf.mxu2  ;;  %v1807_v22 = vpop.f32.mrf.mxu3  ;;  %v1343_v19 = vadd.f32 %v4492_v32, %v5031_v34  ;;  %v1867_v41 = vmax.f32 %v1148_v11, 0.0  ;;  %v1154_v59 = vadd.f32 %v4492_v32, %v5032_v58  ;;  %v2278_v13 = vadd.f32 %v2277_v50, %v2276_v63  ;;  %v5039_v28 = vld [vmem:[#allocation31_spill] sm:$0xff] }
 0x239   :  { %v1808_v23 = vadd.f32 %v4492_v32, %v1807_v22  ;;  %v4691_v44 = vpop.f32.mrf.mxu0  ;;  %v4693_v60 = vpop.f32.mrf.mxu1  ;;  %v1930_v10 = vmax.f32 %v1337_v18, 0.0  ;;  %v2142_v14 = vadd.f32 %v2141_v3, %v2140_v33  ;;  %v1346_v51 = vadd.f32 %v4492_v32, %v5033_v43 }
 0x23a   :  { %v1157_v21 = vadd.f32 %v4492_v32, %v5034_v0  ;;  %v2281_v29 = vsel %vm2099_vm2, %v1929_v61, 0.0  ;;  %v2145_v53 = vsel %vm2099_vm2, %v1866_v27, 0.0  ;;  %v1931_v8 = vmax.f32 %v1340_v62, 0.0 }
 0x23b   :  { %v2087_v52 = vmax.f32 %v1808_v23, 0.0  ;;  %v1868_v2 = vmax.f32 %v1151_v46, 0.0  ;;  %v2280_v20 = vadd.f32 %v2279_v37, %v2278_v13  ;;  %v1932_v39 = vmax.f32 %v1343_v19, 0.0 }
 0x23c   :  { %v1349_v12 = vadd.f32 %v4492_v32, %v5035_v17  ;;  %v2283_v47 = vsel %vm2099_vm2, %v1930_v10, 0.0  ;;  %v2147_v38 = vsel %vm2099_vm2, %v1867_v41, 0.0  ;;  %v1869_v35 = vmax.f32 %v1154_v59, 0.0  ;;  %v5041_v41 = vld [vmem:[#allocation33_spill] sm:$0xff]  ;;  %v5042_v59 = vld [vmem:[#allocation34_spill] sm:$0xff] }
 0x23d   :  { %v2622_v42 = vsel %vm2099_vm2, %v2087_v52, 0.0  ;;  %v1160_v36 = vadd.f32 %v4492_v32, %v5036_v40  ;;  %v2282_v22 = vadd.f32 %v2281_v29, %v2280_v20  ;;  %v1933_v55 = vmax.f32 %v1346_v51, 0.0 }
 0x23e   :  { %v4712_v9 = vadd.f32 %v2622_v42, %v2621_v57  ;;  %v2144_v57 = vadd.f32 %v2143_v56, %v2142_v14  ;;  %v1870_v30 = vmax.f32 %v1157_v21, 0.0  ;;  %v2285_v23 = vsel %vm2099_vm2, %v1931_v8, 0.0 }
 0x23f   :  { %v2149_v63 = vsel %vm2099_vm2, %v1868_v2, 0.0  ;;  %v1352_v18 = vadd.f32 %v4492_v32, %v5037_v7  ;;  %v1163_v11 = vadd.f32 %v4492_v32, %v5038_v5  ;;  %v2284_v33 = vadd.f32 %v2283_v47, %v2282_v22 }
 0x240   :  { %v4720_v1 = vpop.f32.mrf.mxu2  ;;  %v4722_v4 = vpop.f32.mrf.mxu3  ;;  %v2146_v24 = vadd.f32 %v2145_v53, %v2144_v57  ;;  %v2287_v3 = vsel %vm2099_vm2, %v1932_v39, 0.0  ;;  %v1934_v52 = vmax.f32 %v1349_v12, 0.0  ;;  %v2151_v61 = vsel %vm2099_vm2, %v1869_v35, 0.0  ;;  %v5043_v57 = vld [vmem:[#allocation35_spill] sm:$0xff] }
 0x241   :  { %v4726_v48 = vpop.f32.mrf.mxu0  ;;  %v4728_v16 = vpop.f32.mrf.mxu1  ;;  %v1871_v27 = vmax.f32 %v1160_v36, 0.0  ;;  %v1355_v62 = vadd.f32 %v4492_v32, %v5039_v28  ;;  %v1166_v46 = vadd.f32 %v4492_v32, %v5040_v49  ;;  %v2286_v37 = vadd.f32 %v2285_v23, %v2284_v33 }
 0x242   :  { %v2148_v50 = vadd.f32 %v2147_v38, %v2146_v24  ;;  %v2289_v34 = vsel %vm2099_vm2, %v1933_v55, 0.0  ;;  %v2153_v19 = vsel %vm2099_vm2, %v1870_v30, 0.0  ;;  %v1935_v42 = vmax.f32 %v1352_v18, 0.0 }
 0x243   :  { %v1872_v10 = vmax.f32 %v1163_v11, 0.0  ;;  %v1358_v58 = vadd.f32 %v4492_v32, %v5041_v41  ;;  %v1169_v13 = vadd.f32 %v4492_v32, %v5042_v59  ;;  %v2288_v51 = vadd.f32 %v2287_v3, %v2286_v37 }
 0x244   :  { %v2150_v56 = vadd.f32 %v2149_v63, %v2148_v50  ;;  %v2291_v21 = vsel %vm2099_vm2, %v1934_v52, 0.0  ;;  %v2155_v8 = vsel %vm2099_vm2, %v1871_v27, 0.0  ;;  %v1936_v2 = vmax.f32 %v1355_v62, 0.0 }
 0x245   :  { %v1873_v20 = vmax.f32 %v1166_v46, 0.0  ;;  %v1361_v39 = vadd.f32 %v4492_v32, %v5043_v57  ;;  %v2290_v17 = vadd.f32 %v2289_v34, %v2288_v51  ;;  %v2293_v47 = vsel %vm2099_vm2, %v1935_v42, 0.0  ;;  %v5044_v42 = vld [vmem:[#allocation2_spill] sm:$0xff]  ;;  %v5045_v51 = vld [vmem:[#allocation3_spill] sm:$0xff] }
 0x246   :  { %v2152_v0 = vadd.f32 %v2151_v61, %v2150_v56  ;;  %v2157_v38 = vsel %vm2099_vm2, %v1872_v10, 0.0  ;;  %v1937_v35 = vmax.f32 %v1358_v58, 0.0  ;;  %v1874_v40 = vmax.f32 %v1169_v13, 0.0 }
 0x247   :  { %v2292_v36 = vadd.f32 %v2291_v21, %v2290_v17  ;;  %v2295_v24 = vsel %vm2099_vm2, %v1936_v2, 0.0  ;;  %v2159_v55 = vsel %vm2099_vm2, %v1873_v20, 0.0  ;;  %v1938_v30 = vmax.f32 %v1361_v39, 0.0  ;;  %v5046_v20 = vld [vmem:[#allocation36_spill] sm:$0xff] }
 0x248   :  { %v4752_v14 = vpop.f32.mrf.mxu2  ;;  %v4754_v43 = vpop.f32.mrf.mxu3  ;;  %v2154_v12 = vadd.f32 %v2153_v19, %v2152_v0  ;;  %v2297_v7 = vsel %vm2099_vm2, %v1937_v35, 0.0  ;;  %v2161_v18 = vsel %vm2099_vm2, %v1874_v40, 0.0  ;;  %v1457_v10 = vadd.f32 %v4492_v32, %v5044_v42 }
 0x249   :  { %v4757_v29 = vpop.f32.mrf.mxu0  ;;  %v4759_v53 = vpop.f32.mrf.mxu1  ;;  %v2294_v23 = vadd.f32 %v2293_v47, %v2292_v36  ;;  %v2299_v61 = vsel %vm2099_vm2, %v1938_v30, 0.0  ;;  %v1424_v58 = vadd.f32 %v4492_v32, %v4637_v54  ;;  %v1235_v13 = vadd.f32 %v4492_v32, %v4662_v25 }
 0x24a   :  { %v2156_v22 = vadd.f32 %v2155_v8, %v2154_v12  ;;  %v4795_v0 = vadd.f32 %v4492_v32, %v5045_v51  ;;  %v1427_v21 = vadd.f32 %v4492_v32, %v4664_v31  ;;  %v1970_v8 = vmax.f32 %v1457_v10, 0.0 }
 0x24b   :  { %v2296_v33 = vadd.f32 %v2295_v24, %v2294_v23  ;;  %v2439_v57 = vrot.slane %v5046_v20, 4  ;;  %v1959_v39 = vmax.f32 %v1424_v58, 0.0  ;;  %v1616_v17 = vadd.f32 %v4492_v32, %v4688_v15 }
 0x24c   :  { %v2158_v63 = vadd.f32 %v2157_v38, %v2156_v22  ;;  %v1238_v54 = vadd.f32 %v4492_v32, %v4691_v44  ;;  %v1896_v38 = vmax.f32 %v1235_v13, 0.0  ;;  %v2034_v40 = vmax.f32 %v4795_v0, 0.0 }
 0x24d   :  { %v2298_v27 = vadd.f32 %v2297_v7, %v2296_v33  ;;  %v1960_v36 = vmax.f32 %v1427_v21, 0.0  ;;  %v1430_v22 = vadd.f32 %v4492_v32, %v4693_v60  ;;  %v1619_v15 = vadd.f32 %v4492_v32, %v4720_v1  ;;  %v5047_v1 = vld [vmem:[#allocation37_spill] sm:$0xff] }
 0x24e   :  { %v2160_v50 = vadd.f32 %v2159_v55, %v2158_v63  ;;  %v4816_v44 = vsel %vm2099_vm2, %v1970_v8, 0.0  ;;  %v4821_v55 = vadd.f32 %v2439_v57, %v5046_v20  ;;  %v1811_v30 = vadd.f32 %v4492_v32, %v4722_v4 }
 0x24f   :  { %v2300_v62 = vadd.f32 %v2299_v61, %v2298_v27  ;;  %v2346_v23 = vsel %vm2099_vm2, %v1959_v39, 0.0  ;;  %v2023_v63 = vmax.f32 %v1616_v17, 0.0  ;;  %v1897_v7 = vmax.f32 %v1238_v54, 0.0 }
 0x250   :  { %v4770_v5 = vpop.f32.mrf.mxu2  ;;  %v4772_v11 = vpop.f32.mrf.mxu3  ;;  %v2162_v28 = vadd.f32 %v2161_v18, %v2160_v50  ;;  %v1241_v60 = vadd.f32 %v4492_v32, %v4726_v48  ;;  %v2577_v33 = vrot.slane %v5047_v1, 4  ;;  %v2210_v50 = vsel %vm2099_vm2, %v1896_v38, 0.0 }
 0x251   :  { %v4774_v3 = vpop.f32.mrf.mxu0  ;;  %v4776_v52 = vpop.f32.mrf.mxu1  ;;  %v2301_v56 = vrot.slane %v2300_v62, 4  ;;  %v1433_v61 = vadd.f32 %v4492_v32, %v4728_v16  ;;  %v2348_v27 = vsel %vm2099_vm2, %v1960_v36, 0.0  ;;  %v2024_v4 = vmax.f32 %v1619_v15, 0.0 }
 0x252   :  { %v2163_v49 = vrot.slane %v2162_v28, 4  ;;  %v2347_v48 = vadd.f32 %v2346_v23, %v4629_v6  ;;  %v1814_v42 = vadd.f32 %v4492_v32, %v4754_v43  ;;  %v2484_v10 = vsel %vm2099_vm2, %v2023_v63, 0.0 }
 0x253   :  { %v2302_v59 = vadd.f32 %v2301_v56, %v2300_v62  ;;  %v1622_v62 = vadd.f32 %v4492_v32, %v4752_v14  ;;  %v2088_v56 = vmax.f32 %v1811_v30, 0.0  ;;  %v1898_v16 = vmax.f32 %v1241_v60, 0.0 }
 0x254   :  { %v2164_v41 = vadd.f32 %v2163_v49, %v2162_v28  ;;  %v1961_v28 = vmax.f32 %v1430_v22, 0.0  ;;  %v2441_v49 = vrot.slane %v4821_v55, 2  ;;  %v1436_v58 = vadd.f32 %v4492_v32, %v4759_v53 }
 0x255   :  { %v2303_v47 = vrot.slane %v2302_v59, 2  ;;  %v2211_v14 = vadd.f32 %v2210_v50, %v4655_v26  ;;  %v2349_v51 = vadd.f32 %v2348_v27, %v2347_v48  ;;  %v1962_v6 = vmax.f32 %v1433_v61, 0.0 }
 0x256   :  { %v2165_v2 = vrot.slane %v2164_v41, 2  ;;  %v1244_v21 = vadd.f32 %v4492_v32, %v4757_v29  ;;  %v2486_v20 = vsel %vm2099_vm2, %v2024_v4, 0.0  ;;  %v2025_v57 = vmax.f32 %v1622_v62, 0.0 }
 0x257   :  { %v4828_v18 = vadd.f32 %v2303_v47, %v2302_v59  ;;  %v1439_v53 = vadd.f32 %v4492_v32, %v4776_v52  ;;  %v2485_v39 = vadd.f32 %v2484_v10, %v4680_v45  ;;  %v2624_v26 = vsel %vm2099_vm2, %v2088_v56, 0.0 }
 0x258   :  { %v4779_v46 = vpop.f32.mrf.mxu2  ;;  %v4781_v37 = vpop.f32.mrf.mxu3  ;;  %v4818_v24 = vadd.f32 %v2165_v2, %v2164_v41  ;;  %v2212_v41 = vsel %vm2099_vm2, %v1897_v7, 0.0  ;;  %v2350_v2 = vsel %vm2099_vm2, %v1961_v28, 0.0  ;;  %v2089_v54 = vmax.f32 %v1814_v42, 0.0 }
 0x259   :  { %v4783_v34 = vpop.f32.mrf.mxu0  ;;  %v4785_v19 = vpop.f32.mrf.mxu1  ;;  %v2213_v17 = vadd.f32 %v2212_v41, %v2211_v14  ;;  %v2214_v47 = vsel %vm2099_vm2, %v1898_v16, 0.0  ;;  %v1963_v38 = vmax.f32 %v1436_v58, 0.0  ;;  %v1625_v29 = vadd.f32 %v4492_v32, %v4770_v5 }
 0x25a   :  { %v1442_v36 = vadd.f32 %v4492_v32, %v4785_v19  ;;  %v2351_v22 = vadd.f32 %v2350_v2, %v2349_v51  ;;  %v2487_v15 = vadd.f32 %v2486_v20, %v2485_v39  ;;  %v2352_v30 = vsel %vm2099_vm2, %v1962_v6, 0.0 }
 0x25b   :  { %v1899_v52 = vmax.f32 %v1244_v21, 0.0  ;;  %v2488_v45 = vsel %vm2099_vm2, %v2025_v57, 0.0  ;;  %v1817_v23 = vadd.f32 %v4492_v32, %v4772_v11  ;;  %v1964_v63 = vmax.f32 %v1439_v53, 0.0 }
 0x25c   :  { %v2625_v60 = vadd.f32 %v2624_v26, %v4712_v9  ;;  %v2215_v50 = vadd.f32 %v2214_v47, %v2213_v17  ;;  %v2626_v5 = vsel %vm2099_vm2, %v2089_v54, 0.0  ;;  %v1247_v19 = vadd.f32 %v4492_v32, %v4774_v3 }
 0x25d   :  { %v2354_v61 = vsel %vm2099_vm2, %v1963_v38, 0.0  ;;  %v2026_v27 = vmax.f32 %v1625_v29, 0.0  ;;  %v1965_v28 = vmax.f32 %v1442_v36, 0.0  ;;  %v2353_v11 = vadd.f32 %v2352_v30, %v2351_v22 }
 0x25e   :  { %v2489_v56 = vadd.f32 %v2488_v45, %v2487_v15  ;;  %v1250_v9 = vadd.f32 %v4492_v32, %v4783_v34  ;;  %v2090_v41 = vmax.f32 %v1817_v23, 0.0  ;;  %v2356_v3 = vsel %vm2099_vm2, %v1964_v63, 0.0 }
 0x25f   :  { %v2627_v14 = vadd.f32 %v2626_v5, %v2625_v60  ;;  %v2355_v51 = vadd.f32 %v2354_v61, %v2353_v11  ;;  %v1900_v6 = vmax.f32 %v1247_v19, 0.0  ;;  %v1628_v21 = vadd.f32 %v4492_v32, %v4779_v46 }
 0x260   :  { %v4804_v12 = vpop.f32.mrf.mxu2  ;;  %v4806_v25 = vpop.f32.mrf.mxu3  ;;  %v2358_v2 = vsel %vm2099_vm2, %v1965_v28, 0.0  ;;  %v1820_v39 = vadd.f32 %v4492_v32, %v4781_v37  ;;  %v1901_v17 = vmax.f32 %v1250_v9, 0.0  ;;  %v2628_v26 = vsel %vm2099_vm2, %v2090_v41, 0.0 }
 0x261   :  { %v4808_v35 = vpop.f32.mrf.mxu0  ;;  %v1444_v31 = vpop.f32.mrf.mxu1  ;;  %v2357_v53 = vadd.f32 %v2356_v3, %v2355_v51  ;;  %v2218_v29 = vsel %vm2099_vm2, %v1900_v6, 0.0  ;;  %v2027_v36 = vmax.f32 %v1628_v21, 0.0  ;;  %v4902_v45 = vadd.f32 %v2628_v26, %v2627_v14 }
 0x262   :  { %v1445_v7 = vadd.f32 %v4492_v32, %v1444_v31  ;;  %v2216_v31 = vsel %vm2099_vm2, %v1899_v52, 0.0  ;;  %v1253_v34 = vadd.f32 %v4492_v32, %v4808_v35  ;;  %v4896_v35 = vld [vmem:[%s4970_s2] ss:$0 sm:$0xff]  ;;  %v2091_v23 = vmax.f32 %v1820_v39, 0.0 }
 0x263   :  { %v2217_v57 = vadd.f32 %v2216_v31, %v2215_v50  ;;  %v2359_v22 = vadd.f32 %v2358_v2, %v2357_v53  ;;  %v1631_v37 = vadd.f32 %v4896_v35, %v4804_v12  ;;  %v2220_v63 = vsel %vm2099_vm2, %v1901_v17, 0.0 }
 0x264   :  { %v1966_v16 = vmax.f32 %v1445_v7, 0.0  ;;  %v1902_v15 = vmax.f32 %v1253_v34, 0.0  ;;  %v2492_v28 = vsel %vm2099_vm2, %v2027_v36, 0.0 }
 0x266   :  { %v2360_v54 = vsel %vm2099_vm2, %v1966_v16, 0.0  ;;  %v2222_v31 = vsel %vm2099_vm2, %v1902_v15, 0.0 }
 0x267   :  { %v2361_v7 = vadd.f32 %v2360_v54, %v2359_v22 }
 0x268   :  { %v4845_v59 = vpop.f32.mrf.mxu2  ;;  %v4847_v13 = vpop.f32.mrf.mxu3 }
 0x269   :  { %v1255_v43 = vpop.f32.mrf.mxu0  ;;  %v1447_v8 = vpop.f32.mrf.mxu1 }
 0x26a   :  { %v1448_v4 = vadd.f32 %v4492_v32, %v1447_v8  ;;  %v2490_v8 = vsel %vm2099_vm2, %v2026_v27, 0.0  ;;  %v1256_v46 = vadd.f32 %v4492_v32, %v1255_v43  ;;  %v2219_v27 = vadd.f32 %v2218_v29, %v2217_v57 }
 0x26b   :  { %v2491_v38 = vadd.f32 %v2490_v8, %v2489_v56  ;;  %v2028_v56 = vmax.f32 %v1631_v37, 0.0 }
 0x26c   :  { %v1967_v20 = vmax.f32 %v1448_v4, 0.0  ;;  %v1903_v5 = vmax.f32 %v1256_v46, 0.0  ;;  %v1634_v4 = vadd.f32 %v4896_v35, %v4845_v59  ;;  %v2221_v41 = vadd.f32 %v2220_v63, %v2219_v27 }
 0x26d   :  { %v2493_v34 = vadd.f32 %v2492_v28, %v2491_v38 }
 0x26e   :  { %v2362_v30 = vsel %vm2099_vm2, %v1967_v20, 0.0  ;;  %v2224_v14 = vsel %vm2099_vm2, %v1903_v5, 0.0  ;;  %v2223_v6 = vadd.f32 %v2222_v31, %v2221_v41  ;;  %v2029_v21 = vmax.f32 %v1634_v4, 0.0 }
 0x26f   :  { %v2363_v11 = vadd.f32 %v2362_v30, %v2361_v7  ;;  %v2494_v20 = vsel %vm2099_vm2, %v2028_v56, 0.0 }
 0x270   :  { %v1636_v62 = vpop.f32.mrf.mxu2  ;;  %v4874_v48 = vpop.f32.mrf.mxu3  ;;  %v2225_v39 = vadd.f32 %v2224_v14, %v2223_v6  ;;  %v2495_v30 = vadd.f32 %v2494_v20, %v2493_v34 }
 0x271   :  { %v1258_v42 = vpop.f32.mrf.mxu0  ;;  %v1450_v10 = vpop.f32.mrf.mxu1  ;;  %v1637_v3 = vadd.f32 %v4896_v35, %v1636_v62  ;;  %v1826_v62 = vadd.f32 %v4896_v35, %v4847_v13  ;;  %v1829_v38 = vadd.f32 %v4896_v35, %v4874_v48  ;;  %v2496_v13 = vsel %vm2099_vm2, %v2029_v21, 0.0 }
 0x272   :  { %v1451_v58 = vadd.f32 %v4492_v32, %v1450_v10  ;;  %v1259_v52 = vadd.f32 %v4896_v35, %v1258_v42  ;;  %v2630_v10 = vsel %vm2099_vm2, %v2091_v23, 0.0 }
 0x273   :  { %v2030_v17 = vmax.f32 %v1637_v3, 0.0  ;;  %v2094_v5 = vmax.f32 %v1829_v38, 0.0 }
 0x274   :  { %v1968_v47 = vmax.f32 %v1451_v58, 0.0  ;;  %v1904_v9 = vmax.f32 %v1259_v52, 0.0  ;;  %v1823_v58 = vadd.f32 %v4896_v35, %v4806_v25  ;;  %v2093_v52 = vmax.f32 %v1826_v62, 0.0 }
 0x275   :  { %v2498_v23 = vsel %vm2099_vm2, %v2030_v17, 0.0 }
 0x276   :  { %v2364_v19 = vsel %vm2099_vm2, %v1968_v47, 0.0  ;;  %v2226_v57 = vsel %vm2099_vm2, %v1904_v9, 0.0  ;;  %v2092_v47 = vmax.f32 %v1823_v58, 0.0  ;;  %v2634_v4 = vsel %vm2099_vm2, %v2093_v52, 0.0 }
 0x277   :  { %v2365_v16 = vadd.f32 %v2364_v19, %v2363_v11  ;;  %v2227_v22 = vadd.f32 %v2226_v57, %v2225_v39  ;;  %v2578_v58 = vadd.f32 %v2577_v33, %v5047_v1 }
 0x278   :  { %v1639_v32 = vpop.f32.mrf.mxu2  ;;  %v1831_v43 = vpop.f32.mrf.mxu3  ;;  %v2632_v48 = vsel %vm2099_vm2, %v2092_v47, 0.0 }
 0x279   :  { %v1261_v60 = vpop.f32.mrf.mxu0  ;;  %v1453_v50 = vpop.f32.mrf.mxu1  ;;  %v1640_v8 = vadd.f32 %v4896_v35, %v1639_v32 }
 0x27a   :  { %v1262_v12 = vadd.f32 %v4896_v35, %v1261_v60  ;;  %v1454_v61 = vadd.f32 %v4896_v35, %v1453_v50  ;;  %v2497_v50 = vadd.f32 %v2496_v13, %v2495_v30 }
 0x27b   :  { %v2031_v37 = vmax.f32 %v1640_v8, 0.0  ;;  %v2167_v8 = vrot.slane %v4818_v24, 1 }
 0x27c   :  { %v1969_v42 = vmax.f32 %v1454_v61, 0.0  ;;  %v1905_v51 = vmax.f32 %v1262_v12, 0.0  ;;  %v2499_v11 = vadd.f32 %v2498_v23, %v2497_v50 }
 0x27d   :  { %v2500_v12 = vsel %vm2099_vm2, %v2031_v37, 0.0 }
 0x27e   :  { %v2366_v59 = vsel %vm2099_vm2, %v1969_v42, 0.0  ;;  %v2228_v29 = vsel %vm2099_vm2, %v1905_v51, 0.0 }
 0x27f   :  { %v2367_v2 = vadd.f32 %v2366_v59, %v2365_v16  ;;  %v2229_v63 = vadd.f32 %v2228_v29, %v2227_v22 }
 0x280   :  { %v1642_v53 = vpop.f32.mrf.mxu2  ;;  %v1834_v25 = vpop.f32.mrf.mxu3 }
 0x281   :  { %v2369_v26 = vadd.f32 %v4816_v44, %v2367_v2  ;;  %v1643_v54 = vadd.f32 %v4896_v35, %v1642_v53  ;;  %v1264_v46 = vpop.f32.mrf.mxu0  ;;  %v1832_v44 = vadd.f32 %v4896_v35, %v1831_v43  ;;  %v1835_v27 = vadd.f32 %v4896_v35, %v1834_v25 }
 0x282   :  { %v1265_v36 = vadd.f32 %v4896_v35, %v1264_v46  ;;  %v2631_v43 = vadd.f32 %v2630_v10, %v4902_v45  ;;  %v2636_v45 = vsel %vm2099_vm2, %v2094_v5, 0.0  ;;  %v2501_v10 = vadd.f32 %v2500_v12, %v2499_v11 }
 0x283   :  { %v2370_v15 = vrot.slane %v2369_v26, 4  ;;  %v2032_v60 = vmax.f32 %v1643_v54, 0.0  ;;  %v2095_v56 = vmax.f32 %v1832_v44, 0.0  ;;  %v2096_v59 = vmax.f32 %v1835_v27, 0.0 }
 0x284   :  { %v1906_v32 = vmax.f32 %v1265_v36, 0.0  ;;  %v2633_v14 = vadd.f32 %v2632_v48, %v2631_v43  ;;  %v2442_v2 = vadd.f32 %v2441_v49, %v4821_v55  ;;  %v2506_v53 = vsel %vm2099_vm2, %v2034_v40, 0.0 }
 0x285   :  { %v2371_v7 = vadd.f32 %v2370_v15, %v2369_v26  ;;  %v2502_v42 = vsel %vm2099_vm2, %v2032_v60, 0.0  ;;  %v2638_v62 = vsel %vm2099_vm2, %v2095_v56, 0.0  ;;  %v2305_v25 = vrot.slane %v4828_v18, 1 }
 0x286   :  { %v2230_v19 = vsel %vm2099_vm2, %v1906_v32, 0.0  ;;  %v2635_v34 = vadd.f32 %v2634_v4, %v2633_v14  ;;  %v2503_v20 = vadd.f32 %v2502_v42, %v2501_v10  ;;  %v2579_v26 = vrot.slane %v2578_v58, 2 }
 0x287   :  { %v2372_v61 = vrot.slane %v2371_v7, 2  ;;  %v2231_v28 = vadd.f32 %v2230_v19, %v2229_v63  ;;  %v2640_v55 = vsel %vm2099_vm2, %v2096_v59, 0.0  ;;  %v2443_v46 = vrot.slane %v2442_v2, 1 }
 0x288   :  { %v1645_v31 = vpop.f32.mrf.mxu2  ;;  %v1837_v9 = vpop.f32.mrf.mxu3  ;;  %v2637_v39 = vadd.f32 %v2636_v45, %v2635_v34  ;;  %v2168_v36 = vadd.f32 %v2167_v8, %v4818_v24  ;;  %v2306_v22 = vadd.f32 %v2305_v25, %v4828_v18  ;;  %v2580_v30 = vadd.f32 %v2579_v26, %v2578_v58 }
 0x289   :  { %v2232_v41 = vrot.slane %v2231_v28, 4  ;;  %v1646_v3 = vadd.f32 %v4896_v35, %v1645_v31  ;;  %v1838_v16 = vadd.f32 %v4896_v35, %v1837_v9  ;;  %v2373_v51 = vadd.f32 %v2372_v61, %v2371_v7 }
 0x28a   :  { %v2639_v47 = vadd.f32 %v2638_v62, %v2637_v39  ;;  %v2444_v23 = vadd.f32 %v2443_v46, %v2442_v2  ;;  %v2652_v60 = vmul.f32 0.00390625, %v2168_v36  ;;  %v2654_v50 = vmul.f32 0.00390625, %v2306_v22 }
 0x28b   :  { %v2233_v6 = vadd.f32 %v2232_v41, %v2231_v28  ;;  %v2033_v21 = vmax.f32 %v1646_v3, 0.0  ;;  %v2097_v33 = vmax.f32 %v1838_v16, 0.0  ;;  %v2374_v54 = vrot.slane %v2373_v51, 1 }
 0x28c   :  { %v2641_v37 = vadd.f32 %v2640_v55, %v2639_v47  ;;  %v2581_v18 = vrot.slane %v2580_v30, 1  ;;  %v2656_v61 = vmul.f32 0.00390625, %v2444_v23 }
 0x28d   :  { %v2234_v57 = vrot.slane %v2233_v6, 2  ;;  %v2504_v1 = vsel %vm2099_vm2, %v2033_v21, 0.0  ;;  %v2642_v0 = vsel %vm2099_vm2, %v2097_v33, 0.0  ;;  %v2375_v52 = vadd.f32 %v2374_v54, %v2373_v51  ;;  %v2988_v21 = vld [vmem:[%s4972_s4] ss:$0 sm:$0xff] }
 0x28e   :  { %v2505_v17 = vadd.f32 %v2504_v1, %v2503_v20  ;;  %v2643_v7 = vadd.f32 %v2642_v0, %v2641_v37  ;;  %v2582_v9 = vadd.f32 %v2581_v18, %v2580_v30 }
 0x28f   :  { %v2235_v49 = vadd.f32 %v2234_v57, %v2233_v6  ;;  %v2655_v19 = vmul.f32 0.00390625, %v2375_v52 }
 0x290   :  { %v2507_v38 = vadd.f32 %v2506_v53, %v2505_v17  ;;  %v1840_v29 = vpop.f32.mrf.mxu3  ;;  %v2658_v58 = vmul.f32 0.00390625, %v2582_v9 }
 0x291   :  { %v2236_v13 = vrot.slane %v2235_v49, 1  ;;  %v1841_v40 = vadd.f32 %v4896_v35, %v1840_v29 }
 0x292   :  { %v2508_v15 = vrot.slane %v2507_v38, 4 }
 0x293   :  { %v2237_v44 = vadd.f32 %v2236_v13, %v2235_v49  ;;  %v2098_v32 = vmax.f32 %v1841_v40, 0.0 }
 0x294   :  { %v2509_v63 = vadd.f32 %v2508_v15, %v2507_v38 }
 0x295   :  { %v2653_v48 = vmul.f32 0.00390625, %v2237_v44  ;;  %v2644_v24 = vsel %vm2099_vm2, %v2098_v32, 0.0 }
 0x296   :  { %v2510_v5 = vrot.slane %v2509_v63, 2  ;;  %v2645_v35 = vadd.f32 %v2644_v24, %v2643_v7 }
 0x297   :  { %v2674_v12 = vsel %vm2673_vm3, %v2653_v48, %v2652_v60 }
 0x298   :  { %v2511_v27 = vadd.f32 %v2510_v5, %v2509_v63  ;;  %v2646_v28 = vrot.slane %v2645_v35, 4  ;;  %v2676_v43 = vsel %vm2675_vm4, %v2654_v50, %v2674_v12 }
 0x299   :  { %v2678_v4 = vsel %vm2677_vm5, %v2655_v19, %v2676_v43 }
 0x29a   :  { %v2512_v11 = vrot.slane %v2511_v27, 1  ;;  %v2647_v56 = vadd.f32 %v2646_v28, %v2645_v35  ;;  %v2680_v31 = vsel %vm2679_vm6, %v2656_v61, %v2678_v4 }
 0x29c   :  { %v2513_v42 = vadd.f32 %v2512_v11, %v2511_v27  ;;  %v2648_v41 = vrot.slane %v2647_v56, 2 }
 0x29e   :  { %v2657_v3 = vmul.f32 0.00390625, %v2513_v42  ;;  %v2649_v16 = vadd.f32 %v2648_v41, %v2647_v56 }
 0x2a0   :  { %v2650_v14 = vrot.slane %v2649_v16, 1  ;;  %v2682_v45 = vsel %vm2681_vm7, %v2657_v3, %v2680_v31 }
 0x2a1   :  { %v2684_v10 = vsel %vm2683_vm8, %v2658_v58, %v2682_v45 }
 0x2a2   :  { %v2651_v51 = vadd.f32 %v2650_v14, %v2649_v16 }
 0x2a4   :  { %v2659_v59 = vmul.f32 0.00390625, %v2651_v51 }
 0x2a6   :  { %v2686_v6 = vsel %vm2685_vm9, %v2659_v59, %v2684_v10 }
 0x2a7   :  { %2971 = vmatmul.msk.f32.vlgmr.msrb.gmra.mxu1 %vm2099_vm2, %v2686_v6 }
 0x324   :  { %v2706_v8 = vpop.f32.mrf.mxu1 }
 0x325   :  { %v2707_v2 = vadd.f32 %v2988_v21, %v2706_v8 }
 0x327   :  { %2709 = vst [vmem:[%s4973_s5] sm:$0xff] %v2707_v2 }

</bundles_post_ra>
